<compile_context>
chip_gen: v6e
topology: v6e:2x2x1
jax: 0.10.0
libtpu: 0.0.40
codegen_flags: <defaults>
</compile_context>

<pallas_src>
import jax
import jax.numpy as jnp
import numpy as np
from jax.experimental import pallas as pl
from jax.experimental.pallas import tpu as pltpu

N_STEPS = 10          # fixed inside the module's forward()
BETA2 = 0.6           # readout Leaky beta (learn_beta=False -> compile-time constant)
# TODO(synk): if the readout ever enables learn_beta, pass beta2 as an SMEM scalar instead.


def snn_kernel(beta1_ref, thr1_ref,                    # SMEM scalars, shape (1,)
               x_ref,                                  # VMEM (B, T, V)
               w_in_ref, b_in_ref,                     # VMEM (V, H), (1, H)
               w_rec_ref, b_rec_ref,                   # VMEM (H, H), (1, H)
               w_out_ref, b_out_ref,                   # VMEM (H, V), (1, V)
               xhat_ref, r_ref, spk_ref, mem1_ref):    # VMEM outputs (B, T, F)
    B, T, V = x_ref.shape
    H = w_rec_ref.shape[0]
    f32 = jnp.float32

    # ---- loop-invariant scalars (snntorch clamps beta inside the state fn)
    beta1 = jnp.clip(beta1_ref[0], 0.0, 1.0)
    thr1 = thr1_ref[0]

    w_in = w_in_ref[...]
    w_rec = w_rec_ref[...]
    w_out = w_out_ref[...]
    bias_in = b_in_ref[...] + b_rec_ref[...]     # b_rec is added every step -> fold it once
    b_out = b_out_ref[...]

    # ---- loop-invariant broadcasts, hoisted (JAX does not CSE broadcast_in_dim
    #      and the time loop below is fully unrolled).
    zeros_row = jnp.zeros((1, H), f32)
    thr_row = jnp.full((1, H), thr1, f32)
    beta1_row = jnp.full((1, H), beta1, f32)
    t_iota = jax.lax.broadcasted_iota(jnp.int32, (T, 1), 0)   # time index, (T, 1)

    # Independent per-sample recurrences (B is tiny and static -> unrolled;
    # the two serial chains interleave freely in the single basic block).
    for b in range(B):
        # hoisted input projection for this sample: one (T,V)@(V,H) MXU matmul
        y_b = jnp.dot(x_ref[b], w_in, preferred_element_type=f32) + bias_in   # (T, H)

        # hidden-state init (init_rleaky / init_leaky / reset_hidden -> zeros)
        mem1 = zeros_row
        spk1 = zeros_row
        mem2 = zeros_row

        # register-resident histories; the output refs are written once, after the loop
        r_hist = jnp.zeros((T, H), f32)
        spk_hist = jnp.zeros((T, H), f32)
        mem1_hist = jnp.zeros((T, H), f32)

        # ---- serial 10-step recurrence, fully unrolled.  Only spk1 @ W_rec is
        #      on the latency-critical chain.
        for t in range(N_STEPS):
            rec = jnp.dot(spk1, w_rec, preferred_element_type=f32)       # (1, H)
            reset = jnp.where(mem1 > thr_row, thr_row, zeros_row)        # subtract-reset term
            mem1 = beta1_row * mem1 + y_b[t:t + 1, :] + rec - reset
            spk1 = jnp.where(mem1 > thr_row, 1.0, 0.0).astype(f32)       # heaviside spike
            mem2 = BETA2 * mem2 + spk1                                   # Leaky readout, reset='none'

            # scatter this step into the register-resident histories (one-hot select)
            sel = t_iota == t                                            # (T, 1)
            r_hist = jnp.where(sel, mem2, r_hist)
            spk_hist = jnp.where(sel, spk1, spk_hist)
            mem1_hist = jnp.where(sel, mem1, mem1_hist)

        # single writeback per output per sample, already in (B, T, F) layout
        r_ref[b] = r_hist
        spk_ref[b] = spk_hist
        mem1_ref[b] = mem1_hist
        # hoisted readout projection fed from the register-resident r history
        xhat_ref[b] = jnp.dot(r_hist, w_out, preferred_element_type=f32) + b_out


def basic_forward(x, params):
    """x: (B, T, V) float32. Returns (xhat, r, spk, mem1), each (B, N_STEPS, .)."""
    B, T, V = x.shape
    H = params["w_rec"].shape[0]
    assert T >= N_STEPS
    if T != N_STEPS:
        x = x[:, :N_STEPS, :]
    if x.dtype != jnp.float32:
        x = x.astype(jnp.float32)

    vmem = pl.BlockSpec(memory_space=pltpu.MemorySpace.VMEM)   # whole array VMEM-resident
    smem = pl.BlockSpec(memory_space=pltpu.MemorySpace.SMEM)   # learnable scalars on the scalar path

    out_shape = (
        jax.ShapeDtypeStruct((B, N_STEPS, V), jnp.float32),    # xhat
        jax.ShapeDtypeStruct((B, N_STEPS, H), jnp.float32),    # r (= mem2)
        jax.ShapeDtypeStruct((B, N_STEPS, H), jnp.float32),    # spk1
        jax.ShapeDtypeStruct((B, N_STEPS, H), jnp.float32),    # mem1
    )

    # TODO(synk): if B ever scales, add a batch grid with
    # dimension_semantics=("parallel",) (shards across v7x's 2 TensorCores) and
    # pad output lane dims to 128 for unmasked stores.
    return pl.pallas_call(
        snn_kernel,
        out_shape=out_shape,
        in_specs=[smem, smem,                   # beta1, thr1
                  vmem,                         # x (B, T, V)
                  vmem, vmem,                   # input layer  (W^T, b)
                  vmem, vmem,                   # recurrent layer (W^T, b)
                  vmem, vmem],                  # output layer (W^T, b)
        out_specs=(vmem, vmem, vmem, vmem),
    )(params["beta1"], params["thr1"],
      x,
      params["w_in"], params["b_in"],
      params["w_rec"], params["b_rec"],
      params["w_out"], params["b_out"])


def reference_forward(x, params):
    """Pure-JAX reference of the same recurrence (for the correctness check)."""
    B = x.shape[0]
    H = params["w_rec"].shape[0]
    beta1 = jnp.clip(params["beta1"][0], 0.0, 1.0)
    thr1 = params["thr1"][0]
    mem1 = jnp.zeros((B, H), jnp.float32)
    spk1 = jnp.zeros((B, H), jnp.float32)
    mem2 = jnp.zeros((B, H), jnp.float32)
    xh, rs, sp, m1 = [], [], [], []
    for t in range(N_STEPS):
        y = x[:, t].astype(jnp.float32) @ params["w_in"] + params["b_in"]
        reset = (mem1 - thr1 > 0.0).astype(jnp.float32)
        rec = spk1 @ params["w_rec"] + params["b_rec"]
        mem1 = beta1 * mem1 + y + rec - reset * thr1
        spk1 = (mem1 - thr1 > 0.0).astype(jnp.float32)
        mem2 = BETA2 * mem2 + spk1
        xhat = mem2 @ params["w_out"] + params["b_out"]
        xh.append(xhat); rs.append(mem2); sp.append(spk1); m1.append(mem1)
    stack = lambda lst: jnp.stack(lst, axis=1)
    return stack(xh), stack(rs), stack(sp), stack(m1)


def init_params(key, input_size, num_hidden):
    ks = jax.random.split(key, 6)

    def linear(kw, kb, fan_in, fan_out):
        bound = 1.0 / np.sqrt(fan_in)
        # stored as (in, out) i.e. W^T, so the kernel computes x @ W^T + b
        w = jax.random.uniform(kw, (fan_in, fan_out), jnp.float32, -bound, bound)
        b = jax.random.uniform(kb, (1, fan_out), jnp.float32, -bound, bound)
        return w, b

    w_in, b_in = linear(ks[0], ks[1], input_size, num_hidden)
    w_rec, b_rec = linear(ks[2], ks[3], num_hidden, num_hidden)
    w_out, b_out = linear(ks[4], ks[5], num_hidden, input_size)
    return dict(
        w_in=w_in, b_in=b_in,
        w_rec=w_rec, b_rec=b_rec,
        w_out=w_out, b_out=b_out,
        beta1=jnp.full((1,), 0.6, jnp.float32),   # RLeaky learnable beta (init 0.6)
        thr1=jnp.full((1,), 1.0, jnp.float32),    # RLeaky learnable threshold (init 1.0)
    )


if __name__ == "__main__":
    B, T, V, H = 2, N_STEPS, 4, 32   # batch, time_steps, variates (input_size), num_hidden
    key = jax.random.PRNGKey(0)
    kx, kp = jax.random.split(key)
    x = jax.random.normal(kx, (B, T, V), jnp.float32)
    params = init_params(kp, V, H)

    outs = jax.block_until_ready(basic_forward(x, params))

    refs = reference_forward(x, params)
    for o, r in zip(outs, refs):
        np.testing.assert_allclose(np.asarray(o), np.asarray(r), rtol=1e-5, atol=1e-5)

    print("KERNEL_OK")
</pallas_src>

<mosaic_0001>
module attributes {stable_mosaic.version = 11 : i64} {
  func.func @snn_kernel(%arg0: memref<1xf32, #tpu.memory_space<smem>>, %arg1: memref<1xf32, #tpu.memory_space<smem>>, %arg2: memref<2x10x4xf32, #tpu.memory_space<vmem>>, %arg3: memref<4x32xf32, #tpu.memory_space<vmem>>, %arg4: memref<1x32xf32, #tpu.memory_space<vmem>>, %arg5: memref<32x32xf32, #tpu.memory_space<vmem>>, %arg6: memref<1x32xf32, #tpu.memory_space<vmem>>, %arg7: memref<32x4xf32, #tpu.memory_space<vmem>>, %arg8: memref<1x4xf32, #tpu.memory_space<vmem>>, %arg9: memref<2x10x4xf32, #tpu.memory_space<vmem>>, %arg10: memref<2x10x32xf32, #tpu.memory_space<vmem>>, %arg11: memref<2x10x32xf32, #tpu.memory_space<vmem>>, %arg12: memref<2x10x32xf32, #tpu.memory_space<vmem>>) attributes {dimension_semantics = [], scalar_prefetch = 0 : i64, scratch_operands = 0 : i64, tpu.core_type = #tpu.core_type<tc>} {
    %c0 = arith.constant 0 : index
    %0 = memref.load %arg0[%c0] : memref<1xf32, #tpu.memory_space<smem>>
    %cst = arith.constant 0.000000e+00 : f32
    %cst_0 = arith.constant 1.000000e+00 : f32
    %1 = arith.maximumf %cst, %0 : f32
    %2 = arith.minimumf %cst_0, %1 : f32
    %c0_1 = arith.constant 0 : index
    %3 = memref.load %arg1[%c0_1] : memref<1xf32, #tpu.memory_space<smem>>
    %c0_2 = arith.constant 0 : index
    %c0_3 = arith.constant 0 : index
    %4 = vector.load %arg3[%c0_2, %c0_3] : memref<4x32xf32, #tpu.memory_space<vmem>>, vector<4x32xf32>
    %c0_4 = arith.constant 0 : index
    %c0_5 = arith.constant 0 : index
    %5 = vector.load %arg5[%c0_4, %c0_5] : memref<32x32xf32, #tpu.memory_space<vmem>>, vector<32x32xf32>
    %c0_6 = arith.constant 0 : index
    %c0_7 = arith.constant 0 : index
    %6 = vector.load %arg7[%c0_6, %c0_7] : memref<32x4xf32, #tpu.memory_space<vmem>>, vector<32x4xf32>
    %c0_8 = arith.constant 0 : index
    %c0_9 = arith.constant 0 : index
    %7 = vector.load %arg4[%c0_8, %c0_9] : memref<1x32xf32, #tpu.memory_space<vmem>>, vector<1x32xf32>
    %c0_10 = arith.constant 0 : index
    %c0_11 = arith.constant 0 : index
    %8 = vector.load %arg6[%c0_10, %c0_11] : memref<1x32xf32, #tpu.memory_space<vmem>>, vector<1x32xf32>
    %9 = arith.addf %7, %8 : vector<1x32xf32>
    %c0_12 = arith.constant 0 : index
    %c0_13 = arith.constant 0 : index
    %10 = vector.load %arg8[%c0_12, %c0_13] : memref<1x4xf32, #tpu.memory_space<vmem>>, vector<1x4xf32>
    %cst_14 = arith.constant 0.000000e+00 : f32
    %11 = vector.broadcast %cst_14 : f32 to vector<1x32xf32>
    %12 = vector.broadcast %3 : f32 to vector<1x32xf32>
    %13 = vector.broadcast %2 : f32 to vector<1x32xf32>
    %14 = tpu.iota {dimensions = array<i32: 0>} : vector<10x1xi32>
    %c0_15 = arith.constant 0 : index
    %c0_16 = arith.constant 0 : index
    %c0_17 = arith.constant 0 : index
    %15 = vector.load %arg2[%c0_15, %c0_16, %c0_17] : memref<2x10x4xf32, #tpu.memory_space<vmem>>, vector<1x10x4xf32>
    %16 = vector.shape_cast %15 : vector<1x10x4xf32> to vector<10x4xf32>
    %cst_18 = arith.constant dense<0.000000e+00> : vector<10x32xf32>
    %17 = tpu.matmul %16, %4, %cst_18 {dimension_numbers = #tpu.dot_dimension_numbers<[1], [0], [0], [1], [0, 0, 1, 1], [], []>} : vector<10x4xf32>, vector<4x32xf32>, vector<10x32xf32> -> vector<10x32xf32>
    %18 = vector.broadcast %9 : vector<1x32xf32> to vector<10x32xf32>
    %19 = arith.addf %17, %18 : vector<10x32xf32>
    %cst_19 = arith.constant 0.000000e+00 : f32
    %20 = vector.broadcast %cst_19 : f32 to vector<10x32xf32>
    %cst_20 = arith.constant 0.000000e+00 : f32
    %21 = vector.broadcast %cst_20 : f32 to vector<10x32xf32>
    %cst_21 = arith.constant 0.000000e+00 : f32
    %22 = vector.broadcast %cst_21 : f32 to vector<10x32xf32>
    %cst_22 = arith.constant dense<0.000000e+00> : vector<1x32xf32>
    %23 = tpu.matmul %11, %5, %cst_22 {dimension_numbers = #tpu.dot_dimension_numbers<[1], [0], [0], [1], [0, 0, 1, 1], [], []>} : vector<1x32xf32>, vector<32x32xf32>, vector<1x32xf32> -> vector<1x32xf32>
    %24 = arith.cmpf ogt, %11, %12 : vector<1x32xf32>
    %25 = arith.select %24, %12, %11 : vector<1x32xi1>, vector<1x32xf32>
    %26 = arith.mulf %13, %11 : vector<1x32xf32>
    %27 = vector.extract_strided_slice %19 {offsets = [0, 0], sizes = [1, 32], strides = [1, 1]} : vector<10x32xf32> to vector<1x32xf32>
    %28 = arith.addf %26, %27 : vector<1x32xf32>
    %29 = arith.addf %28, %23 : vector<1x32xf32>
    %30 = arith.subf %29, %25 : vector<1x32xf32>
    %31 = arith.cmpf ogt, %30, %12 : vector<1x32xf32>
    %cst_23 = arith.constant 1.000000e+00 : f32
    %cst_24 = arith.constant 0.000000e+00 : f32
    %32 = vector.broadcast %cst_23 : f32 to vector<1x32xf32>
    %33 = vector.broadcast %cst_24 : f32 to vector<1x32xf32>
    %34 = arith.select %31, %32, %33 : vector<1x32xi1>, vector<1x32xf32>
    %cst_25 = arith.constant 6.000000e-01 : f32
    %35 = vector.broadcast %cst_25 : f32 to vector<1x32xf32>
    %36 = arith.mulf %35, %11 : vector<1x32xf32>
    %37 = arith.addf %36, %34 : vector<1x32xf32>
    %c0_i32 = arith.constant 0 : i32
    %38 = vector.broadcast %c0_i32 : i32 to vector<10x1xi32>
    %39 = arith.cmpi eq, %14, %38 : vector<10x1xi32>
    %40 = vector.shape_cast %39 : vector<10x1xi1> to vector<10x1xi1>
    %41 = vector.broadcast %40 : vector<10x1xi1> to vector<10x32xi1>
    %42 = vector.shape_cast %37 : vector<1x32xf32> to vector<1x32xf32>
    %43 = vector.broadcast %42 : vector<1x32xf32> to vector<10x32xf32>
    %44 = arith.select %41, %43, %20 : vector<10x32xi1>, vector<10x32xf32>
    %45 = vector.shape_cast %39 : vector<10x1xi1> to vector<10x1xi1>
    %46 = vector.broadcast %45 : vector<10x1xi1> to vector<10x32xi1>
    %47 = vector.shape_cast %34 : vector<1x32xf32> to vector<1x32xf32>
    %48 = vector.broadcast %47 : vector<1x32xf32> to vector<10x32xf32>
    %49 = arith.select %46, %48, %21 : vector<10x32xi1>, vector<10x32xf32>
    %50 = vector.shape_cast %39 : vector<10x1xi1> to vector<10x1xi1>
    %51 = vector.broadcast %50 : vector<10x1xi1> to vector<10x32xi1>
    %52 = vector.shape_cast %30 : vector<1x32xf32> to vector<1x32xf32>
    %53 = vector.broadcast %52 : vector<1x32xf32> to vector<10x32xf32>
    %54 = arith.select %51, %53, %22 : vector<10x32xi1>, vector<10x32xf32>
    %cst_26 = arith.constant dense<0.000000e+00> : vector<1x32xf32>
    %55 = tpu.matmul %34, %5, %cst_26 {dimension_numbers = #tpu.dot_dimension_numbers<[1], [0], [0], [1], [0, 0, 1, 1], [], []>} : vector<1x32xf32>, vector<32x32xf32>, vector<1x32xf32> -> vector<1x32xf32>
    %56 = arith.cmpf ogt, %30, %12 : vector<1x32xf32>
    %57 = arith.select %56, %12, %11 : vector<1x32xi1>, vector<1x32xf32>
    %58 = arith.mulf %13, %30 : vector<1x32xf32>
    %59 = vector.extract_strided_slice %19 {offsets = [1, 0], sizes = [1, 32], strides = [1, 1]} : vector<10x32xf32> to vector<1x32xf32>
    %60 = arith.addf %58, %59 : vector<1x32xf32>
    %61 = arith.addf %60, %55 : vector<1x32xf32>
    %62 = arith.subf %61, %57 : vector<1x32xf32>
    %63 = arith.cmpf ogt, %62, %12 : vector<1x32xf32>
    %cst_27 = arith.constant 1.000000e+00 : f32
    %cst_28 = arith.constant 0.000000e+00 : f32
    %64 = vector.broadcast %cst_27 : f32 to vector<1x32xf32>
    %65 = vector.broadcast %cst_28 : f32 to vector<1x32xf32>
    %66 = arith.select %63, %64, %65 : vector<1x32xi1>, vector<1x32xf32>
    %cst_29 = arith.constant 6.000000e-01 : f32
    %67 = vector.broadcast %cst_29 : f32 to vector<1x32xf32>
    %68 = arith.mulf %67, %37 : vector<1x32xf32>
    %69 = arith.addf %68, %66 : vector<1x32xf32>
    %c1_i32 = arith.constant 1 : i32
    %70 = vector.broadcast %c1_i32 : i32 to vector<10x1xi32>
    %71 = arith.cmpi eq, %14, %70 : vector<10x1xi32>
    %72 = vector.shape_cast %71 : vector<10x1xi1> to vector<10x1xi1>
    %73 = vector.broadcast %72 : vector<10x1xi1> to vector<10x32xi1>
    %74 = vector.shape_cast %69 : vector<1x32xf32> to vector<1x32xf32>
    %75 = vector.broadcast %74 : vector<1x32xf32> to vector<10x32xf32>
    %76 = arith.select %73, %75, %44 : vector<10x32xi1>, vector<10x32xf32>
    %77 = vector.shape_cast %71 : vector<10x1xi1> to vector<10x1xi1>
    %78 = vector.broadcast %77 : vector<10x1xi1> to vector<10x32xi1>
    %79 = vector.shape_cast %66 : vector<1x32xf32> to vector<1x32xf32>
    %80 = vector.broadcast %79 : vector<1x32xf32> to vector<10x32xf32>
    %81 = arith.select %78, %80, %49 : vector<10x32xi1>, vector<10x32xf32>
    %82 = vector.shape_cast %71 : vector<10x1xi1> to vector<10x1xi1>
    %83 = vector.broadcast %82 : vector<10x1xi1> to vector<10x32xi1>
    %84 = vector.shape_cast %62 : vector<1x32xf32> to vector<1x32xf32>
    %85 = vector.broadcast %84 : vector<1x32xf32> to vector<10x32xf32>
    %86 = arith.select %83, %85, %54 : vector<10x32xi1>, vector<10x32xf32>
    %cst_30 = arith.constant dense<0.000000e+00> : vector<1x32xf32>
    %87 = tpu.matmul %66, %5, %cst_30 {dimension_numbers = #tpu.dot_dimension_numbers<[1], [0], [0], [1], [0, 0, 1, 1], [], []>} : vector<1x32xf32>, vector<32x32xf32>, vector<1x32xf32> -> vector<1x32xf32>
    %88 = arith.cmpf ogt, %62, %12 : vector<1x32xf32>
    %89 = arith.select %88, %12, %11 : vector<1x32xi1>, vector<1x32xf32>
    %90 = arith.mulf %13, %62 : vector<1x32xf32>
    %91 = vector.extract_strided_slice %19 {offsets = [2, 0], sizes = [1, 32], strides = [1, 1]} : vector<10x32xf32> to vector<1x32xf32>
    %92 = arith.addf %90, %91 : vector<1x32xf32>
    %93 = arith.addf %92, %87 : vector<1x32xf32>
    %94 = arith.subf %93, %89 : vector<1x32xf32>
    %95 = arith.cmpf ogt, %94, %12 : vector<1x32xf32>
    %cst_31 = arith.constant 1.000000e+00 : f32
    %cst_32 = arith.constant 0.000000e+00 : f32
    %96 = vector.broadcast %cst_31 : f32 to vector<1x32xf32>
    %97 = vector.broadcast %cst_32 : f32 to vector<1x32xf32>
    %98 = arith.select %95, %96, %97 : vector<1x32xi1>, vector<1x32xf32>
    %cst_33 = arith.constant 6.000000e-01 : f32
    %99 = vector.broadcast %cst_33 : f32 to vector<1x32xf32>
    %100 = arith.mulf %99, %69 : vector<1x32xf32>
    %101 = arith.addf %100, %98 : vector<1x32xf32>
    %c2_i32 = arith.constant 2 : i32
    %102 = vector.broadcast %c2_i32 : i32 to vector<10x1xi32>
    %103 = arith.cmpi eq, %14, %102 : vector<10x1xi32>
    %104 = vector.shape_cast %103 : vector<10x1xi1> to vector<10x1xi1>
    %105 = vector.broadcast %104 : vector<10x1xi1> to vector<10x32xi1>
    %106 = vector.shape_cast %101 : vector<1x32xf32> to vector<1x32xf32>
    %107 = vector.broadcast %106 : vector<1x32xf32> to vector<10x32xf32>
    %108 = arith.select %105, %107, %76 : vector<10x32xi1>, vector<10x32xf32>
    %109 = vector.shape_cast %103 : vector<10x1xi1> to vector<10x1xi1>
    %110 = vector.broadcast %109 : vector<10x1xi1> to vector<10x32xi1>
    %111 = vector.shape_cast %98 : vector<1x32xf32> to vector<1x32xf32>
    %112 = vector.broadcast %111 : vector<1x32xf32> to vector<10x32xf32>
    %113 = arith.select %110, %112, %81 : vector<10x32xi1>, vector<10x32xf32>
    %114 = vector.shape_cast %103 : vector<10x1xi1> to vector<10x1xi1>
    %115 = vector.broadcast %114 : vector<10x1xi1> to vector<10x32xi1>
    %116 = vector.shape_cast %94 : vector<1x32xf32> to vector<1x32xf32>
    %117 = vector.broadcast %116 : vector<1x32xf32> to vector<10x32xf32>
    %118 = arith.select %115, %117, %86 : vector<10x32xi1>, vector<10x32xf32>
    %cst_34 = arith.constant dense<0.000000e+00> : vector<1x32xf32>
    %119 = tpu.matmul %98, %5, %cst_34 {dimension_numbers = #tpu.dot_dimension_numbers<[1], [0], [0], [1], [0, 0, 1, 1], [], []>} : vector<1x32xf32>, vector<32x32xf32>, vector<1x32xf32> -> vector<1x32xf32>
    %120 = arith.cmpf ogt, %94, %12 : vector<1x32xf32>
    %121 = arith.select %120, %12, %11 : vector<1x32xi1>, vector<1x32xf32>
    %122 = arith.mulf %13, %94 : vector<1x32xf32>
    %123 = vector.extract_strided_slice %19 {offsets = [3, 0], sizes = [1, 32], strides = [1, 1]} : vector<10x32xf32> to vector<1x32xf32>
    %124 = arith.addf %122, %123 : vector<1x32xf32>
    %125 = arith.addf %124, %119 : vector<1x32xf32>
    %126 = arith.subf %125, %121 : vector<1x32xf32>
    %127 = arith.cmpf ogt, %126, %12 : vector<1x32xf32>
    %cst_35 = arith.constant 1.000000e+00 : f32
    %cst_36 = arith.constant 0.000000e+00 : f32
    %128 = vector.broadcast %cst_35 : f32 to vector<1x32xf32>
    %129 = vector.broadcast %cst_36 : f32 to vector<1x32xf32>
    %130 = arith.select %127, %128, %129 : vector<1x32xi1>, vector<1x32xf32>
    %cst_37 = arith.constant 6.000000e-01 : f32
    %131 = vector.broadcast %cst_37 : f32 to vector<1x32xf32>
    %132 = arith.mulf %131, %101 : vector<1x32xf32>
    %133 = arith.addf %132, %130 : vector<1x32xf32>
    %c3_i32 = arith.constant 3 : i32
    %134 = vector.broadcast %c3_i32 : i32 to vector<10x1xi32>
    %135 = arith.cmpi eq, %14, %134 : vector<10x1xi32>
    %136 = vector.shape_cast %135 : vector<10x1xi1> to vector<10x1xi1>
    %137 = vector.broadcast %136 : vector<10x1xi1> to vector<10x32xi1>
    %138 = vector.shape_cast %133 : vector<1x32xf32> to vector<1x32xf32>
    %139 = vector.broadcast %138 : vector<1x32xf32> to vector<10x32xf32>
    %140 = arith.select %137, %139, %108 : vector<10x32xi1>, vector<10x32xf32>
    %141 = vector.shape_cast %135 : vector<10x1xi1> to vector<10x1xi1>
    %142 = vector.broadcast %141 : vector<10x1xi1> to vector<10x32xi1>
    %143 = vector.shape_cast %130 : vector<1x32xf32> to vector<1x32xf32>
    %144 = vector.broadcast %143 : vector<1x32xf32> to vector<10x32xf32>
    %145 = arith.select %142, %144, %113 : vector<10x32xi1>, vector<10x32xf32>
    %146 = vector.shape_cast %135 : vector<10x1xi1> to vector<10x1xi1>
    %147 = vector.broadcast %146 : vector<10x1xi1> to vector<10x32xi1>
    %148 = vector.shape_cast %126 : vector<1x32xf32> to vector<1x32xf32>
    %149 = vector.broadcast %148 : vector<1x32xf32> to vector<10x32xf32>
    %150 = arith.select %147, %149, %118 : vector<10x32xi1>, vector<10x32xf32>
    %cst_38 = arith.constant dense<0.000000e+00> : vector<1x32xf32>
    %151 = tpu.matmul %130, %5, %cst_38 {dimension_numbers = #tpu.dot_dimension_numbers<[1], [0], [0], [1], [0, 0, 1, 1], [], []>} : vector<1x32xf32>, vector<32x32xf32>, vector<1x32xf32> -> vector<1x32xf32>
    %152 = arith.cmpf ogt, %126, %12 : vector<1x32xf32>
    %153 = arith.select %152, %12, %11 : vector<1x32xi1>, vector<1x32xf32>
    %154 = arith.mulf %13, %126 : vector<1x32xf32>
    %155 = vector.extract_strided_slice %19 {offsets = [4, 0], sizes = [1, 32], strides = [1, 1]} : vector<10x32xf32> to vector<1x32xf32>
    %156 = arith.addf %154, %155 : vector<1x32xf32>
    %157 = arith.addf %156, %151 : vector<1x32xf32>
    %158 = arith.subf %157, %153 : vector<1x32xf32>
    %159 = arith.cmpf ogt, %158, %12 : vector<1x32xf32>
    %cst_39 = arith.constant 1.000000e+00 : f32
    %cst_40 = arith.constant 0.000000e+00 : f32
    %160 = vector.broadcast %cst_39 : f32 to vector<1x32xf32>
    %161 = vector.broadcast %cst_40 : f32 to vector<1x32xf32>
    %162 = arith.select %159, %160, %161 : vector<1x32xi1>, vector<1x32xf32>
    %cst_41 = arith.constant 6.000000e-01 : f32
    %163 = vector.broadcast %cst_41 : f32 to vector<1x32xf32>
    %164 = arith.mulf %163, %133 : vector<1x32xf32>
    %165 = arith.addf %164, %162 : vector<1x32xf32>
    %c4_i32 = arith.constant 4 : i32
    %166 = vector.broadcast %c4_i32 : i32 to vector<10x1xi32>
    %167 = arith.cmpi eq, %14, %166 : vector<10x1xi32>
    %168 = vector.shape_cast %167 : vector<10x1xi1> to vector<10x1xi1>
    %169 = vector.broadcast %168 : vector<10x1xi1> to vector<10x32xi1>
    %170 = vector.shape_cast %165 : vector<1x32xf32> to vector<1x32xf32>
    %171 = vector.broadcast %170 : vector<1x32xf32> to vector<10x32xf32>
    %172 = arith.select %169, %171, %140 : vector<10x32xi1>, vector<10x32xf32>
    %173 = vector.shape_cast %167 : vector<10x1xi1> to vector<10x1xi1>
    %174 = vector.broadcast %173 : vector<10x1xi1> to vector<10x32xi1>
    %175 = vector.shape_cast %162 : vector<1x32xf32> to vector<1x32xf32>
    %176 = vector.broadcast %175 : vector<1x32xf32> to vector<10x32xf32>
    %177 = arith.select %174, %176, %145 : vector<10x32xi1>, vector<10x32xf32>
    %178 = vector.shape_cast %167 : vector<10x1xi1> to vector<10x1xi1>
    %179 = vector.broadcast %178 : vector<10x1xi1> to vector<10x32xi1>
    %180 = vector.shape_cast %158 : vector<1x32xf32> to vector<1x32xf32>
    %181 = vector.broadcast %180 : vector<1x32xf32> to vector<10x32xf32>
    %182 = arith.select %179, %181, %150 : vector<10x32xi1>, vector<10x32xf32>
    %cst_42 = arith.constant dense<0.000000e+00> : vector<1x32xf32>
    %183 = tpu.matmul %162, %5, %cst_42 {dimension_numbers = #tpu.dot_dimension_numbers<[1], [0], [0], [1], [0, 0, 1, 1], [], []>} : vector<1x32xf32>, vector<32x32xf32>, vector<1x32xf32> -> vector<1x32xf32>
    %184 = arith.cmpf ogt, %158, %12 : vector<1x32xf32>
    %185 = arith.select %184, %12, %11 : vector<1x32xi1>, vector<1x32xf32>
    %186 = arith.mulf %13, %158 : vector<1x32xf32>
    %187 = vector.extract_strided_slice %19 {offsets = [5, 0], sizes = [1, 32], strides = [1, 1]} : vector<10x32xf32> to vector<1x32xf32>
    %188 = arith.addf %186, %187 : vector<1x32xf32>
    %189 = arith.addf %188, %183 : vector<1x32xf32>
    %190 = arith.subf %189, %185 : vector<1x32xf32>
    %191 = arith.cmpf ogt, %190, %12 : vector<1x32xf32>
    %cst_43 = arith.constant 1.000000e+00 : f32
    %cst_44 = arith.constant 0.000000e+00 : f32
    %192 = vector.broadcast %cst_43 : f32 to vector<1x32xf32>
    %193 = vector.broadcast %cst_44 : f32 to vector<1x32xf32>
    %194 = arith.select %191, %192, %193 : vector<1x32xi1>, vector<1x32xf32>
    %cst_45 = arith.constant 6.000000e-01 : f32
    %195 = vector.broadcast %cst_45 : f32 to vector<1x32xf32>
    %196 = arith.mulf %195, %165 : vector<1x32xf32>
    %197 = arith.addf %196, %194 : vector<1x32xf32>
    %c5_i32 = arith.constant 5 : i32
    %198 = vector.broadcast %c5_i32 : i32 to vector<10x1xi32>
    %199 = arith.cmpi eq, %14, %198 : vector<10x1xi32>
    %200 = vector.shape_cast %199 : vector<10x1xi1> to vector<10x1xi1>
    %201 = vector.broadcast %200 : vector<10x1xi1> to vector<10x32xi1>
    %202 = vector.shape_cast %197 : vector<1x32xf32> to vector<1x32xf32>
    %203 = vector.broadcast %202 : vector<1x32xf32> to vector<10x32xf32>
    %204 = arith.select %201, %203, %172 : vector<10x32xi1>, vector<10x32xf32>
    %205 = vector.shape_cast %199 : vector<10x1xi1> to vector<10x1xi1>
    %206 = vector.broadcast %205 : vector<10x1xi1> to vector<10x32xi1>
    %207 = vector.shape_cast %194 : vector<1x32xf32> to vector<1x32xf32>
    %208 = vector.broadcast %207 : vector<1x32xf32> to vector<10x32xf32>
    %209 = arith.select %206, %208, %177 : vector<10x32xi1>, vector<10x32xf32>
    %210 = vector.shape_cast %199 : vector<10x1xi1> to vector<10x1xi1>
    %211 = vector.broadcast %210 : vector<10x1xi1> to vector<10x32xi1>
    %212 = vector.shape_cast %190 : vector<1x32xf32> to vector<1x32xf32>
    %213 = vector.broadcast %212 : vector<1x32xf32> to vector<10x32xf32>
    %214 = arith.select %211, %213, %182 : vector<10x32xi1>, vector<10x32xf32>
    %cst_46 = arith.constant dense<0.000000e+00> : vector<1x32xf32>
    %215 = tpu.matmul %194, %5, %cst_46 {dimension_numbers = #tpu.dot_dimension_numbers<[1], [0], [0], [1], [0, 0, 1, 1], [], []>} : vector<1x32xf32>, vector<32x32xf32>, vector<1x32xf32> -> vector<1x32xf32>
    %216 = arith.cmpf ogt, %190, %12 : vector<1x32xf32>
    %217 = arith.select %216, %12, %11 : vector<1x32xi1>, vector<1x32xf32>
    %218 = arith.mulf %13, %190 : vector<1x32xf32>
    %219 = vector.extract_strided_slice %19 {offsets = [6, 0], sizes = [1, 32], strides = [1, 1]} : vector<10x32xf32> to vector<1x32xf32>
    %220 = arith.addf %218, %219 : vector<1x32xf32>
    %221 = arith.addf %220, %215 : vector<1x32xf32>
    %222 = arith.subf %221, %217 : vector<1x32xf32>
    %223 = arith.cmpf ogt, %222, %12 : vector<1x32xf32>
    %cst_47 = arith.constant 1.000000e+00 : f32
    %cst_48 = arith.constant 0.000000e+00 : f32
    %224 = vector.broadcast %cst_47 : f32 to vector<1x32xf32>
    %225 = vector.broadcast %cst_48 : f32 to vector<1x32xf32>
    %226 = arith.select %223, %224, %225 : vector<1x32xi1>, vector<1x32xf32>
    %cst_49 = arith.constant 6.000000e-01 : f32
    %227 = vector.broadcast %cst_49 : f32 to vector<1x32xf32>
    %228 = arith.mulf %227, %197 : vector<1x32xf32>
    %229 = arith.addf %228, %226 : vector<1x32xf32>
    %c6_i32 = arith.constant 6 : i32
    %230 = vector.broadcast %c6_i32 : i32 to vector<10x1xi32>
    %231 = arith.cmpi eq, %14, %230 : vector<10x1xi32>
    %232 = vector.shape_cast %231 : vector<10x1xi1> to vector<10x1xi1>
    %233 = vector.broadcast %232 : vector<10x1xi1> to vector<10x32xi1>
    %234 = vector.shape_cast %229 : vector<1x32xf32> to vector<1x32xf32>
    %235 = vector.broadcast %234 : vector<1x32xf32> to vector<10x32xf32>
    %236 = arith.select %233, %235, %204 : vector<10x32xi1>, vector<10x32xf32>
    %237 = vector.shape_cast %231 : vector<10x1xi1> to vector<10x1xi1>
    %238 = vector.broadcast %237 : vector<10x1xi1> to vector<10x32xi1>
    %239 = vector.shape_cast %226 : vector<1x32xf32> to vector<1x32xf32>
    %240 = vector.broadcast %239 : vector<1x32xf32> to vector<10x32xf32>
    %241 = arith.select %238, %240, %209 : vector<10x32xi1>, vector<10x32xf32>
    %242 = vector.shape_cast %231 : vector<10x1xi1> to vector<10x1xi1>
    %243 = vector.broadcast %242 : vector<10x1xi1> to vector<10x32xi1>
    %244 = vector.shape_cast %222 : vector<1x32xf32> to vector<1x32xf32>
    %245 = vector.broadcast %244 : vector<1x32xf32> to vector<10x32xf32>
    %246 = arith.select %243, %245, %214 : vector<10x32xi1>, vector<10x32xf32>
    %cst_50 = arith.constant dense<0.000000e+00> : vector<1x32xf32>
    %247 = tpu.matmul %226, %5, %cst_50 {dimension_numbers = #tpu.dot_dimension_numbers<[1], [0], [0], [1], [0, 0, 1, 1], [], []>} : vector<1x32xf32>, vector<32x32xf32>, vector<1x32xf32> -> vector<1x32xf32>
    %248 = arith.cmpf ogt, %222, %12 : vector<1x32xf32>
    %249 = arith.select %248, %12, %11 : vector<1x32xi1>, vector<1x32xf32>
    %250 = arith.mulf %13, %222 : vector<1x32xf32>
    %251 = vector.extract_strided_slice %19 {offsets = [7, 0], sizes = [1, 32], strides = [1, 1]} : vector<10x32xf32> to vector<1x32xf32>
    %252 = arith.addf %250, %251 : vector<1x32xf32>
    %253 = arith.addf %252, %247 : vector<1x32xf32>
    %254 = arith.subf %253, %249 : vector<1x32xf32>
    %255 = arith.cmpf ogt, %254, %12 : vector<1x32xf32>
    %cst_51 = arith.constant 1.000000e+00 : f32
    %cst_52 = arith.constant 0.000000e+00 : f32
    %256 = vector.broadcast %cst_51 : f32 to vector<1x32xf32>
    %257 = vector.broadcast %cst_52 : f32 to vector<1x32xf32>
    %258 = arith.select %255, %256, %257 : vector<1x32xi1>, vector<1x32xf32>
    %cst_53 = arith.constant 6.000000e-01 : f32
    %259 = vector.broadcast %cst_53 : f32 to vector<1x32xf32>
    %260 = arith.mulf %259, %229 : vector<1x32xf32>
    %261 = arith.addf %260, %258 : vector<1x32xf32>
    %c7_i32 = arith.constant 7 : i32
    %262 = vector.broadcast %c7_i32 : i32 to vector<10x1xi32>
    %263 = arith.cmpi eq, %14, %262 : vector<10x1xi32>
    %264 = vector.shape_cast %263 : vector<10x1xi1> to vector<10x1xi1>
    %265 = vector.broadcast %264 : vector<10x1xi1> to vector<10x32xi1>
    %266 = vector.shape_cast %261 : vector<1x32xf32> to vector<1x32xf32>
    %267 = vector.broadcast %266 : vector<1x32xf32> to vector<10x32xf32>
    %268 = arith.select %265, %267, %236 : vector<10x32xi1>, vector<10x32xf32>
    %269 = vector.shape_cast %263 : vector<10x1xi1> to vector<10x1xi1>
    %270 = vector.broadcast %269 : vector<10x1xi1> to vector<10x32xi1>
    %271 = vector.shape_cast %258 : vector<1x32xf32> to vector<1x32xf32>
    %272 = vector.broadcast %271 : vector<1x32xf32> to vector<10x32xf32>
    %273 = arith.select %270, %272, %241 : vector<10x32xi1>, vector<10x32xf32>
    %274 = vector.shape_cast %263 : vector<10x1xi1> to vector<10x1xi1>
    %275 = vector.broadcast %274 : vector<10x1xi1> to vector<10x32xi1>
    %276 = vector.shape_cast %254 : vector<1x32xf32> to vector<1x32xf32>
    %277 = vector.broadcast %276 : vector<1x32xf32> to vector<10x32xf32>
    %278 = arith.select %275, %277, %246 : vector<10x32xi1>, vector<10x32xf32>
    %cst_54 = arith.constant dense<0.000000e+00> : vector<1x32xf32>
    %279 = tpu.matmul %258, %5, %cst_54 {dimension_numbers = #tpu.dot_dimension_numbers<[1], [0], [0], [1], [0, 0, 1, 1], [], []>} : vector<1x32xf32>, vector<32x32xf32>, vector<1x32xf32> -> vector<1x32xf32>
    %280 = arith.cmpf ogt, %254, %12 : vector<1x32xf32>
    %281 = arith.select %280, %12, %11 : vector<1x32xi1>, vector<1x32xf32>
    %282 = arith.mulf %13, %254 : vector<1x32xf32>
    %283 = vector.extract_strided_slice %19 {offsets = [8, 0], sizes = [1, 32], strides = [1, 1]} : vector<10x32xf32> to vector<1x32xf32>
    %284 = arith.addf %282, %283 : vector<1x32xf32>
    %285 = arith.addf %284, %279 : vector<1x32xf32>
    %286 = arith.subf %285, %281 : vector<1x32xf32>
    %287 = arith.cmpf ogt, %286, %12 : vector<1x32xf32>
    %cst_55 = arith.constant 1.000000e+00 : f32
    %cst_56 = arith.constant 0.000000e+00 : f32
    %288 = vector.broadcast %cst_55 : f32 to vector<1x32xf32>
    %289 = vector.broadcast %cst_56 : f32 to vector<1x32xf32>
    %290 = arith.select %287, %288, %289 : vector<1x32xi1>, vector<1x32xf32>
    %cst_57 = arith.constant 6.000000e-01 : f32
    %291 = vector.broadcast %cst_57 : f32 to vector<1x32xf32>
    %292 = arith.mulf %291, %261 : vector<1x32xf32>
    %293 = arith.addf %292, %290 : vector<1x32xf32>
    %c8_i32 = arith.constant 8 : i32
    %294 = vector.broadcast %c8_i32 : i32 to vector<10x1xi32>
    %295 = arith.cmpi eq, %14, %294 : vector<10x1xi32>
    %296 = vector.shape_cast %295 : vector<10x1xi1> to vector<10x1xi1>
    %297 = vector.broadcast %296 : vector<10x1xi1> to vector<10x32xi1>
    %298 = vector.shape_cast %293 : vector<1x32xf32> to vector<1x32xf32>
    %299 = vector.broadcast %298 : vector<1x32xf32> to vector<10x32xf32>
    %300 = arith.select %297, %299, %268 : vector<10x32xi1>, vector<10x32xf32>
    %301 = vector.shape_cast %295 : vector<10x1xi1> to vector<10x1xi1>
    %302 = vector.broadcast %301 : vector<10x1xi1> to vector<10x32xi1>
    %303 = vector.shape_cast %290 : vector<1x32xf32> to vector<1x32xf32>
    %304 = vector.broadcast %303 : vector<1x32xf32> to vector<10x32xf32>
    %305 = arith.select %302, %304, %273 : vector<10x32xi1>, vector<10x32xf32>
    %306 = vector.shape_cast %295 : vector<10x1xi1> to vector<10x1xi1>
    %307 = vector.broadcast %306 : vector<10x1xi1> to vector<10x32xi1>
    %308 = vector.shape_cast %286 : vector<1x32xf32> to vector<1x32xf32>
    %309 = vector.broadcast %308 : vector<1x32xf32> to vector<10x32xf32>
    %310 = arith.select %307, %309, %278 : vector<10x32xi1>, vector<10x32xf32>
    %cst_58 = arith.constant dense<0.000000e+00> : vector<1x32xf32>
    %311 = tpu.matmul %290, %5, %cst_58 {dimension_numbers = #tpu.dot_dimension_numbers<[1], [0], [0], [1], [0, 0, 1, 1], [], []>} : vector<1x32xf32>, vector<32x32xf32>, vector<1x32xf32> -> vector<1x32xf32>
    %312 = arith.cmpf ogt, %286, %12 : vector<1x32xf32>
    %313 = arith.select %312, %12, %11 : vector<1x32xi1>, vector<1x32xf32>
    %314 = arith.mulf %13, %286 : vector<1x32xf32>
    %315 = vector.extract_strided_slice %19 {offsets = [9, 0], sizes = [1, 32], strides = [1, 1]} : vector<10x32xf32> to vector<1x32xf32>
    %316 = arith.addf %314, %315 : vector<1x32xf32>
    %317 = arith.addf %316, %311 : vector<1x32xf32>
    %318 = arith.subf %317, %313 : vector<1x32xf32>
    %319 = arith.cmpf ogt, %318, %12 : vector<1x32xf32>
    %cst_59 = arith.constant 1.000000e+00 : f32
    %cst_60 = arith.constant 0.000000e+00 : f32
    %320 = vector.broadcast %cst_59 : f32 to vector<1x32xf32>
    %321 = vector.broadcast %cst_60 : f32 to vector<1x32xf32>
    %322 = arith.select %319, %320, %321 : vector<1x32xi1>, vector<1x32xf32>
    %cst_61 = arith.constant 6.000000e-01 : f32
    %323 = vector.broadcast %cst_61 : f32 to vector<1x32xf32>
    %324 = arith.mulf %323, %293 : vector<1x32xf32>
    %325 = arith.addf %324, %322 : vector<1x32xf32>
    %c9_i32 = arith.constant 9 : i32
    %326 = vector.broadcast %c9_i32 : i32 to vector<10x1xi32>
    %327 = arith.cmpi eq, %14, %326 : vector<10x1xi32>
    %328 = vector.shape_cast %327 : vector<10x1xi1> to vector<10x1xi1>
    %329 = vector.broadcast %328 : vector<10x1xi1> to vector<10x32xi1>
    %330 = vector.shape_cast %325 : vector<1x32xf32> to vector<1x32xf32>
    %331 = vector.broadcast %330 : vector<1x32xf32> to vector<10x32xf32>
    %332 = arith.select %329, %331, %300 : vector<10x32xi1>, vector<10x32xf32>
    %333 = vector.shape_cast %327 : vector<10x1xi1> to vector<10x1xi1>
    %334 = vector.broadcast %333 : vector<10x1xi1> to vector<10x32xi1>
    %335 = vector.shape_cast %322 : vector<1x32xf32> to vector<1x32xf32>
    %336 = vector.broadcast %335 : vector<1x32xf32> to vector<10x32xf32>
    %337 = arith.select %334, %336, %305 : vector<10x32xi1>, vector<10x32xf32>
    %338 = vector.shape_cast %327 : vector<10x1xi1> to vector<10x1xi1>
    %339 = vector.broadcast %338 : vector<10x1xi1> to vector<10x32xi1>
    %340 = vector.shape_cast %318 : vector<1x32xf32> to vector<1x32xf32>
    %341 = vector.broadcast %340 : vector<1x32xf32> to vector<10x32xf32>
    %342 = arith.select %339, %341, %310 : vector<10x32xi1>, vector<10x32xf32>
    %c0_62 = arith.constant 0 : index
    %c0_63 = arith.constant 0 : index
    %c0_64 = arith.constant 0 : index
    %343 = vector.load %arg10[%c0_62, %c0_63, %c0_64] : memref<2x10x32xf32, #tpu.memory_space<vmem>>, vector<1x10x32xf32>
    %344 = vector.shape_cast %343 : vector<1x10x32xf32> to vector<10x32xf32>
    %345 = vector.shape_cast %332 : vector<10x32xf32> to vector<1x10x32xf32>
    tpu.vector_store %arg10[%c0_62, %c0_63, %c0_64], %345 {strides = array<i32>} : memref<2x10x32xf32, #tpu.memory_space<vmem>>, vector<1x10x32xf32>,
    %c0_65 = arith.constant 0 : index
    %c0_66 = arith.constant 0 : index
    %c0_67 = arith.constant 0 : index
    %346 = vector.load %arg11[%c0_65, %c0_66, %c0_67] : memref<2x10x32xf32, #tpu.memory_space<vmem>>, vector<1x10x32xf32>
    %347 = vector.shape_cast %346 : vector<1x10x32xf32> to vector<10x32xf32>
    %348 = vector.shape_cast %337 : vector<10x32xf32> to vector<1x10x32xf32>
    tpu.vector_store %arg11[%c0_65, %c0_66, %c0_67], %348 {strides = array<i32>} : memref<2x10x32xf32, #tpu.memory_space<vmem>>, vector<1x10x32xf32>,
    %c0_68 = arith.constant 0 : index
    %c0_69 = arith.constant 0 : index
    %c0_70 = arith.constant 0 : index
    %349 = vector.load %arg12[%c0_68, %c0_69, %c0_70] : memref<2x10x32xf32, #tpu.memory_space<vmem>>, vector<1x10x32xf32>
    %350 = vector.shape_cast %349 : vector<1x10x32xf32> to vector<10x32xf32>
    %351 = vector.shape_cast %342 : vector<10x32xf32> to vector<1x10x32xf32>
    tpu.vector_store %arg12[%c0_68, %c0_69, %c0_70], %351 {strides = array<i32>} : memref<2x10x32xf32, #tpu.memory_space<vmem>>, vector<1x10x32xf32>,
    %cst_71 = arith.constant dense<0.000000e+00> : vector<10x4xf32>
    %352 = tpu.matmul %332, %6, %cst_71 {dimension_numbers = #tpu.dot_dimension_numbers<[1], [0], [0], [1], [0, 0, 1, 1], [], []>} : vector<10x32xf32>, vector<32x4xf32>, vector<10x4xf32> -> vector<10x4xf32>
    %353 = vector.broadcast %10 : vector<1x4xf32> to vector<10x4xf32>
    %354 = arith.addf %352, %353 : vector<10x4xf32>
    %c0_72 = arith.constant 0 : index
    %c0_73 = arith.constant 0 : index
    %c0_74 = arith.constant 0 : index
    %355 = vector.load %arg9[%c0_72, %c0_73, %c0_74] : memref<2x10x4xf32, #tpu.memory_space<vmem>>, vector<1x10x4xf32>
    %356 = vector.shape_cast %355 : vector<1x10x4xf32> to vector<10x4xf32>
    %357 = vector.shape_cast %354 : vector<10x4xf32> to vector<1x10x4xf32>
    tpu.vector_store %arg9[%c0_72, %c0_73, %c0_74], %357 {strides = array<i32>} : memref<2x10x4xf32, #tpu.memory_space<vmem>>, vector<1x10x4xf32>,
    %c1 = arith.constant 1 : index
    %c0_75 = arith.constant 0 : index
    %c0_76 = arith.constant 0 : index
    %358 = vector.load %arg2[%c1, %c0_75, %c0_76] : memref<2x10x4xf32, #tpu.memory_space<vmem>>, vector<1x10x4xf32>
    %359 = vector.shape_cast %358 : vector<1x10x4xf32> to vector<10x4xf32>
    %cst_77 = arith.constant dense<0.000000e+00> : vector<10x32xf32>
    %360 = tpu.matmul %359, %4, %cst_77 {dimension_numbers = #tpu.dot_dimension_numbers<[1], [0], [0], [1], [0, 0, 1, 1], [], []>} : vector<10x4xf32>, vector<4x32xf32>, vector<10x32xf32> -> vector<10x32xf32>
    %361 = vector.broadcast %9 : vector<1x32xf32> to vector<10x32xf32>
    %362 = arith.addf %360, %361 : vector<10x32xf32>
    %cst_78 = arith.constant 0.000000e+00 : f32
    %363 = vector.broadcast %cst_78 : f32 to vector<10x32xf32>
    %cst_79 = arith.constant 0.000000e+00 : f32
    %364 = vector.broadcast %cst_79 : f32 to vector<10x32xf32>
    %cst_80 = arith.constant 0.000000e+00 : f32
    %365 = vector.broadcast %cst_80 : f32 to vector<10x32xf32>
    %cst_81 = arith.constant dense<0.000000e+00> : vector<1x32xf32>
    %366 = tpu.matmul %11, %5, %cst_81 {dimension_numbers = #tpu.dot_dimension_numbers<[1], [0], [0], [1], [0, 0, 1, 1], [], []>} : vector<1x32xf32>, vector<32x32xf32>, vector<1x32xf32> -> vector<1x32xf32>
    %367 = arith.cmpf ogt, %11, %12 : vector<1x32xf32>
    %368 = arith.select %367, %12, %11 : vector<1x32xi1>, vector<1x32xf32>
    %369 = arith.mulf %13, %11 : vector<1x32xf32>
    %370 = vector.extract_strided_slice %362 {offsets = [0, 0], sizes = [1, 32], strides = [1, 1]} : vector<10x32xf32> to vector<1x32xf32>
    %371 = arith.addf %369, %370 : vector<1x32xf32>
    %372 = arith.addf %371, %366 : vector<1x32xf32>
    %373 = arith.subf %372, %368 : vector<1x32xf32>
    %374 = arith.cmpf ogt, %373, %12 : vector<1x32xf32>
    %cst_82 = arith.constant 1.000000e+00 : f32
    %cst_83 = arith.constant 0.000000e+00 : f32
    %375 = vector.broadcast %cst_82 : f32 to vector<1x32xf32>
    %376 = vector.broadcast %cst_83 : f32 to vector<1x32xf32>
    %377 = arith.select %374, %375, %376 : vector<1x32xi1>, vector<1x32xf32>
    %cst_84 = arith.constant 6.000000e-01 : f32
    %378 = vector.broadcast %cst_84 : f32 to vector<1x32xf32>
    %379 = arith.mulf %378, %11 : vector<1x32xf32>
    %380 = arith.addf %379, %377 : vector<1x32xf32>
    %c0_i32_85 = arith.constant 0 : i32
    %381 = vector.broadcast %c0_i32_85 : i32 to vector<10x1xi32>
    %382 = arith.cmpi eq, %14, %381 : vector<10x1xi32>
    %383 = vector.shape_cast %382 : vector<10x1xi1> to vector<10x1xi1>
    %384 = vector.broadcast %383 : vector<10x1xi1> to vector<10x32xi1>
    %385 = vector.shape_cast %380 : vector<1x32xf32> to vector<1x32xf32>
    %386 = vector.broadcast %385 : vector<1x32xf32> to vector<10x32xf32>
    %387 = arith.select %384, %386, %363 : vector<10x32xi1>, vector<10x32xf32>
    %388 = vector.shape_cast %382 : vector<10x1xi1> to vector<10x1xi1>
    %389 = vector.broadcast %388 : vector<10x1xi1> to vector<10x32xi1>
    %390 = vector.shape_cast %377 : vector<1x32xf32> to vector<1x32xf32>
    %391 = vector.broadcast %390 : vector<1x32xf32> to vector<10x32xf32>
    %392 = arith.select %389, %391, %364 : vector<10x32xi1>, vector<10x32xf32>
    %393 = vector.shape_cast %382 : vector<10x1xi1> to vector<10x1xi1>
    %394 = vector.broadcast %393 : vector<10x1xi1> to vector<10x32xi1>
    %395 = vector.shape_cast %373 : vector<1x32xf32> to vector<1x32xf32>
    %396 = vector.broadcast %395 : vector<1x32xf32> to vector<10x32xf32>
    %397 = arith.select %394, %396, %365 : vector<10x32xi1>, vector<10x32xf32>
    %cst_86 = arith.constant dense<0.000000e+00> : vector<1x32xf32>
    %398 = tpu.matmul %377, %5, %cst_86 {dimension_numbers = #tpu.dot_dimension_numbers<[1], [0], [0], [1], [0, 0, 1, 1], [], []>} : vector<1x32xf32>, vector<32x32xf32>, vector<1x32xf32> -> vector<1x32xf32>
    %399 = arith.cmpf ogt, %373, %12 : vector<1x32xf32>
    %400 = arith.select %399, %12, %11 : vector<1x32xi1>, vector<1x32xf32>
    %401 = arith.mulf %13, %373 : vector<1x32xf32>
    %402 = vector.extract_strided_slice %362 {offsets = [1, 0], sizes = [1, 32], strides = [1, 1]} : vector<10x32xf32> to vector<1x32xf32>
    %403 = arith.addf %401, %402 : vector<1x32xf32>
    %404 = arith.addf %403, %398 : vector<1x32xf32>
    %405 = arith.subf %404, %400 : vector<1x32xf32>
    %406 = arith.cmpf ogt, %405, %12 : vector<1x32xf32>
    %cst_87 = arith.constant 1.000000e+00 : f32
    %cst_88 = arith.constant 0.000000e+00 : f32
    %407 = vector.broadcast %cst_87 : f32 to vector<1x32xf32>
    %408 = vector.broadcast %cst_88 : f32 to vector<1x32xf32>
    %409 = arith.select %406, %407, %408 : vector<1x32xi1>, vector<1x32xf32>
    %cst_89 = arith.constant 6.000000e-01 : f32
    %410 = vector.broadcast %cst_89 : f32 to vector<1x32xf32>
    %411 = arith.mulf %410, %380 : vector<1x32xf32>
    %412 = arith.addf %411, %409 : vector<1x32xf32>
    %c1_i32_90 = arith.constant 1 : i32
    %413 = vector.broadcast %c1_i32_90 : i32 to vector<10x1xi32>
    %414 = arith.cmpi eq, %14, %413 : vector<10x1xi32>
    %415 = vector.shape_cast %414 : vector<10x1xi1> to vector<10x1xi1>
    %416 = vector.broadcast %415 : vector<10x1xi1> to vector<10x32xi1>
    %417 = vector.shape_cast %412 : vector<1x32xf32> to vector<1x32xf32>
    %418 = vector.broadcast %417 : vector<1x32xf32> to vector<10x32xf32>
    %419 = arith.select %416, %418, %387 : vector<10x32xi1>, vector<10x32xf32>
    %420 = vector.shape_cast %414 : vector<10x1xi1> to vector<10x1xi1>
    %421 = vector.broadcast %420 : vector<10x1xi1> to vector<10x32xi1>
    %422 = vector.shape_cast %409 : vector<1x32xf32> to vector<1x32xf32>
    %423 = vector.broadcast %422 : vector<1x32xf32> to vector<10x32xf32>
    %424 = arith.select %421, %423, %392 : vector<10x32xi1>, vector<10x32xf32>
    %425 = vector.shape_cast %414 : vector<10x1xi1> to vector<10x1xi1>
    %426 = vector.broadcast %425 : vector<10x1xi1> to vector<10x32xi1>
    %427 = vector.shape_cast %405 : vector<1x32xf32> to vector<1x32xf32>
    %428 = vector.broadcast %427 : vector<1x32xf32> to vector<10x32xf32>
    %429 = arith.select %426, %428, %397 : vector<10x32xi1>, vector<10x32xf32>
    %cst_91 = arith.constant dense<0.000000e+00> : vector<1x32xf32>
    %430 = tpu.matmul %409, %5, %cst_91 {dimension_numbers = #tpu.dot_dimension_numbers<[1], [0], [0], [1], [0, 0, 1, 1], [], []>} : vector<1x32xf32>, vector<32x32xf32>, vector<1x32xf32> -> vector<1x32xf32>
    %431 = arith.cmpf ogt, %405, %12 : vector<1x32xf32>
    %432 = arith.select %431, %12, %11 : vector<1x32xi1>, vector<1x32xf32>
    %433 = arith.mulf %13, %405 : vector<1x32xf32>
    %434 = vector.extract_strided_slice %362 {offsets = [2, 0], sizes = [1, 32], strides = [1, 1]} : vector<10x32xf32> to vector<1x32xf32>
    %435 = arith.addf %433, %434 : vector<1x32xf32>
    %436 = arith.addf %435, %430 : vector<1x32xf32>
    %437 = arith.subf %436, %432 : vector<1x32xf32>
    %438 = arith.cmpf ogt, %437, %12 : vector<1x32xf32>
    %cst_92 = arith.constant 1.000000e+00 : f32
    %cst_93 = arith.constant 0.000000e+00 : f32
    %439 = vector.broadcast %cst_92 : f32 to vector<1x32xf32>
    %440 = vector.broadcast %cst_93 : f32 to vector<1x32xf32>
    %441 = arith.select %438, %439, %440 : vector<1x32xi1>, vector<1x32xf32>
    %cst_94 = arith.constant 6.000000e-01 : f32
    %442 = vector.broadcast %cst_94 : f32 to vector<1x32xf32>
    %443 = arith.mulf %442, %412 : vector<1x32xf32>
    %444 = arith.addf %443, %441 : vector<1x32xf32>
    %c2_i32_95 = arith.constant 2 : i32
    %445 = vector.broadcast %c2_i32_95 : i32 to vector<10x1xi32>
    %446 = arith.cmpi eq, %14, %445 : vector<10x1xi32>
    %447 = vector.shape_cast %446 : vector<10x1xi1> to vector<10x1xi1>
    %448 = vector.broadcast %447 : vector<10x1xi1> to vector<10x32xi1>
    %449 = vector.shape_cast %444 : vector<1x32xf32> to vector<1x32xf32>
    %450 = vector.broadcast %449 : vector<1x32xf32> to vector<10x32xf32>
    %451 = arith.select %448, %450, %419 : vector<10x32xi1>, vector<10x32xf32>
    %452 = vector.shape_cast %446 : vector<10x1xi1> to vector<10x1xi1>
    %453 = vector.broadcast %452 : vector<10x1xi1> to vector<10x32xi1>
    %454 = vector.shape_cast %441 : vector<1x32xf32> to vector<1x32xf32>
    %455 = vector.broadcast %454 : vector<1x32xf32> to vector<10x32xf32>
    %456 = arith.select %453, %455, %424 : vector<10x32xi1>, vector<10x32xf32>
    %457 = vector.shape_cast %446 : vector<10x1xi1> to vector<10x1xi1>
    %458 = vector.broadcast %457 : vector<10x1xi1> to vector<10x32xi1>
    %459 = vector.shape_cast %437 : vector<1x32xf32> to vector<1x32xf32>
    %460 = vector.broadcast %459 : vector<1x32xf32> to vector<10x32xf32>
    %461 = arith.select %458, %460, %429 : vector<10x32xi1>, vector<10x32xf32>
    %cst_96 = arith.constant dense<0.000000e+00> : vector<1x32xf32>
    %462 = tpu.matmul %441, %5, %cst_96 {dimension_numbers = #tpu.dot_dimension_numbers<[1], [0], [0], [1], [0, 0, 1, 1], [], []>} : vector<1x32xf32>, vector<32x32xf32>, vector<1x32xf32> -> vector<1x32xf32>
    %463 = arith.cmpf ogt, %437, %12 : vector<1x32xf32>
    %464 = arith.select %463, %12, %11 : vector<1x32xi1>, vector<1x32xf32>
    %465 = arith.mulf %13, %437 : vector<1x32xf32>
    %466 = vector.extract_strided_slice %362 {offsets = [3, 0], sizes = [1, 32], strides = [1, 1]} : vector<10x32xf32> to vector<1x32xf32>
    %467 = arith.addf %465, %466 : vector<1x32xf32>
    %468 = arith.addf %467, %462 : vector<1x32xf32>
    %469 = arith.subf %468, %464 : vector<1x32xf32>
    %470 = arith.cmpf ogt, %469, %12 : vector<1x32xf32>
    %cst_97 = arith.constant 1.000000e+00 : f32
    %cst_98 = arith.constant 0.000000e+00 : f32
    %471 = vector.broadcast %cst_97 : f32 to vector<1x32xf32>
    %472 = vector.broadcast %cst_98 : f32 to vector<1x32xf32>
    %473 = arith.select %470, %471, %472 : vector<1x32xi1>, vector<1x32xf32>
    %cst_99 = arith.constant 6.000000e-01 : f32
    %474 = vector.broadcast %cst_99 : f32 to vector<1x32xf32>
    %475 = arith.mulf %474, %444 : vector<1x32xf32>
    %476 = arith.addf %475, %473 : vector<1x32xf32>
    %c3_i32_100 = arith.constant 3 : i32
    %477 = vector.broadcast %c3_i32_100 : i32 to vector<10x1xi32>
    %478 = arith.cmpi eq, %14, %477 : vector<10x1xi32>
    %479 = vector.shape_cast %478 : vector<10x1xi1> to vector<10x1xi1>
    %480 = vector.broadcast %479 : vector<10x1xi1> to vector<10x32xi1>
    %481 = vector.shape_cast %476 : vector<1x32xf32> to vector<1x32xf32>
    %482 = vector.broadcast %481 : vector<1x32xf32> to vector<10x32xf32>
    %483 = arith.select %480, %482, %451 : vector<10x32xi1>, vector<10x32xf32>
    %484 = vector.shape_cast %478 : vector<10x1xi1> to vector<10x1xi1>
    %485 = vector.broadcast %484 : vector<10x1xi1> to vector<10x32xi1>
    %486 = vector.shape_cast %473 : vector<1x32xf32> to vector<1x32xf32>
    %487 = vector.broadcast %486 : vector<1x32xf32> to vector<10x32xf32>
    %488 = arith.select %485, %487, %456 : vector<10x32xi1>, vector<10x32xf32>
    %489 = vector.shape_cast %478 : vector<10x1xi1> to vector<10x1xi1>
    %490 = vector.broadcast %489 : vector<10x1xi1> to vector<10x32xi1>
    %491 = vector.shape_cast %469 : vector<1x32xf32> to vector<1x32xf32>
    %492 = vector.broadcast %491 : vector<1x32xf32> to vector<10x32xf32>
    %493 = arith.select %490, %492, %461 : vector<10x32xi1>, vector<10x32xf32>
    %cst_101 = arith.constant dense<0.000000e+00> : vector<1x32xf32>
    %494 = tpu.matmul %473, %5, %cst_101 {dimension_numbers = #tpu.dot_dimension_numbers<[1], [0], [0], [1], [0, 0, 1, 1], [], []>} : vector<1x32xf32>, vector<32x32xf32>, vector<1x32xf32> -> vector<1x32xf32>
    %495 = arith.cmpf ogt, %469, %12 : vector<1x32xf32>
    %496 = arith.select %495, %12, %11 : vector<1x32xi1>, vector<1x32xf32>
    %497 = arith.mulf %13, %469 : vector<1x32xf32>
    %498 = vector.extract_strided_slice %362 {offsets = [4, 0], sizes = [1, 32], strides = [1, 1]} : vector<10x32xf32> to vector<1x32xf32>
    %499 = arith.addf %497, %498 : vector<1x32xf32>
    %500 = arith.addf %499, %494 : vector<1x32xf32>
    %501 = arith.subf %500, %496 : vector<1x32xf32>
    %502 = arith.cmpf ogt, %501, %12 : vector<1x32xf32>
    %cst_102 = arith.constant 1.000000e+00 : f32
    %cst_103 = arith.constant 0.000000e+00 : f32
    %503 = vector.broadcast %cst_102 : f32 to vector<1x32xf32>
    %504 = vector.broadcast %cst_103 : f32 to vector<1x32xf32>
    %505 = arith.select %502, %503, %504 : vector<1x32xi1>, vector<1x32xf32>
    %cst_104 = arith.constant 6.000000e-01 : f32
    %506 = vector.broadcast %cst_104 : f32 to vector<1x32xf32>
    %507 = arith.mulf %506, %476 : vector<1x32xf32>
    %508 = arith.addf %507, %505 : vector<1x32xf32>
    %c4_i32_105 = arith.constant 4 : i32
    %509 = vector.broadcast %c4_i32_105 : i32 to vector<10x1xi32>
    %510 = arith.cmpi eq, %14, %509 : vector<10x1xi32>
    %511 = vector.shape_cast %510 : vector<10x1xi1> to vector<10x1xi1>
    %512 = vector.broadcast %511 : vector<10x1xi1> to vector<10x32xi1>
    %513 = vector.shape_cast %508 : vector<1x32xf32> to vector<1x32xf32>
    %514 = vector.broadcast %513 : vector<1x32xf32> to vector<10x32xf32>
    %515 = arith.select %512, %514, %483 : vector<10x32xi1>, vector<10x32xf32>
    %516 = vector.shape_cast %510 : vector<10x1xi1> to vector<10x1xi1>
    %517 = vector.broadcast %516 : vector<10x1xi1> to vector<10x32xi1>
    %518 = vector.shape_cast %505 : vector<1x32xf32> to vector<1x32xf32>
    %519 = vector.broadcast %518 : vector<1x32xf32> to vector<10x32xf32>
    %520 = arith.select %517, %519, %488 : vector<10x32xi1>, vector<10x32xf32>
    %521 = vector.shape_cast %510 : vector<10x1xi1> to vector<10x1xi1>
    %522 = vector.broadcast %521 : vector<10x1xi1> to vector<10x32xi1>
    %523 = vector.shape_cast %501 : vector<1x32xf32> to vector<1x32xf32>
    %524 = vector.broadcast %523 : vector<1x32xf32> to vector<10x32xf32>
    %525 = arith.select %522, %524, %493 : vector<10x32xi1>, vector<10x32xf32>
    %cst_106 = arith.constant dense<0.000000e+00> : vector<1x32xf32>
    %526 = tpu.matmul %505, %5, %cst_106 {dimension_numbers = #tpu.dot_dimension_numbers<[1], [0], [0], [1], [0, 0, 1, 1], [], []>} : vector<1x32xf32>, vector<32x32xf32>, vector<1x32xf32> -> vector<1x32xf32>
    %527 = arith.cmpf ogt, %501, %12 : vector<1x32xf32>
    %528 = arith.select %527, %12, %11 : vector<1x32xi1>, vector<1x32xf32>
    %529 = arith.mulf %13, %501 : vector<1x32xf32>
    %530 = vector.extract_strided_slice %362 {offsets = [5, 0], sizes = [1, 32], strides = [1, 1]} : vector<10x32xf32> to vector<1x32xf32>
    %531 = arith.addf %529, %530 : vector<1x32xf32>
    %532 = arith.addf %531, %526 : vector<1x32xf32>
    %533 = arith.subf %532, %528 : vector<1x32xf32>
    %534 = arith.cmpf ogt, %533, %12 : vector<1x32xf32>
    %cst_107 = arith.constant 1.000000e+00 : f32
    %cst_108 = arith.constant 0.000000e+00 : f32
    %535 = vector.broadcast %cst_107 : f32 to vector<1x32xf32>
    %536 = vector.broadcast %cst_108 : f32 to vector<1x32xf32>
    %537 = arith.select %534, %535, %536 : vector<1x32xi1>, vector<1x32xf32>
    %cst_109 = arith.constant 6.000000e-01 : f32
    %538 = vector.broadcast %cst_109 : f32 to vector<1x32xf32>
    %539 = arith.mulf %538, %508 : vector<1x32xf32>
    %540 = arith.addf %539, %537 : vector<1x32xf32>
    %c5_i32_110 = arith.constant 5 : i32
    %541 = vector.broadcast %c5_i32_110 : i32 to vector<10x1xi32>
    %542 = arith.cmpi eq, %14, %541 : vector<10x1xi32>
    %543 = vector.shape_cast %542 : vector<10x1xi1> to vector<10x1xi1>
    %544 = vector.broadcast %543 : vector<10x1xi1> to vector<10x32xi1>
    %545 = vector.shape_cast %540 : vector<1x32xf32> to vector<1x32xf32>
    %546 = vector.broadcast %545 : vector<1x32xf32> to vector<10x32xf32>
    %547 = arith.select %544, %546, %515 : vector<10x32xi1>, vector<10x32xf32>
    %548 = vector.shape_cast %542 : vector<10x1xi1> to vector<10x1xi1>
    %549 = vector.broadcast %548 : vector<10x1xi1> to vector<10x32xi1>
    %550 = vector.shape_cast %537 : vector<1x32xf32> to vector<1x32xf32>
    %551 = vector.broadcast %550 : vector<1x32xf32> to vector<10x32xf32>
    %552 = arith.select %549, %551, %520 : vector<10x32xi1>, vector<10x32xf32>
    %553 = vector.shape_cast %542 : vector<10x1xi1> to vector<10x1xi1>
    %554 = vector.broadcast %553 : vector<10x1xi1> to vector<10x32xi1>
    %555 = vector.shape_cast %533 : vector<1x32xf32> to vector<1x32xf32>
    %556 = vector.broadcast %555 : vector<1x32xf32> to vector<10x32xf32>
    %557 = arith.select %554, %556, %525 : vector<10x32xi1>, vector<10x32xf32>
    %cst_111 = arith.constant dense<0.000000e+00> : vector<1x32xf32>
    %558 = tpu.matmul %537, %5, %cst_111 {dimension_numbers = #tpu.dot_dimension_numbers<[1], [0], [0], [1], [0, 0, 1, 1], [], []>} : vector<1x32xf32>, vector<32x32xf32>, vector<1x32xf32> -> vector<1x32xf32>
    %559 = arith.cmpf ogt, %533, %12 : vector<1x32xf32>
    %560 = arith.select %559, %12, %11 : vector<1x32xi1>, vector<1x32xf32>
    %561 = arith.mulf %13, %533 : vector<1x32xf32>
    %562 = vector.extract_strided_slice %362 {offsets = [6, 0], sizes = [1, 32], strides = [1, 1]} : vector<10x32xf32> to vector<1x32xf32>
    %563 = arith.addf %561, %562 : vector<1x32xf32>
    %564 = arith.addf %563, %558 : vector<1x32xf32>
    %565 = arith.subf %564, %560 : vector<1x32xf32>
    %566 = arith.cmpf ogt, %565, %12 : vector<1x32xf32>
    %cst_112 = arith.constant 1.000000e+00 : f32
    %cst_113 = arith.constant 0.000000e+00 : f32
    %567 = vector.broadcast %cst_112 : f32 to vector<1x32xf32>
    %568 = vector.broadcast %cst_113 : f32 to vector<1x32xf32>
    %569 = arith.select %566, %567, %568 : vector<1x32xi1>, vector<1x32xf32>
    %cst_114 = arith.constant 6.000000e-01 : f32
    %570 = vector.broadcast %cst_114 : f32 to vector<1x32xf32>
    %571 = arith.mulf %570, %540 : vector<1x32xf32>
    %572 = arith.addf %571, %569 : vector<1x32xf32>
    %c6_i32_115 = arith.constant 6 : i32
    %573 = vector.broadcast %c6_i32_115 : i32 to vector<10x1xi32>
    %574 = arith.cmpi eq, %14, %573 : vector<10x1xi32>
    %575 = vector.shape_cast %574 : vector<10x1xi1> to vector<10x1xi1>
    %576 = vector.broadcast %575 : vector<10x1xi1> to vector<10x32xi1>
    %577 = vector.shape_cast %572 : vector<1x32xf32> to vector<1x32xf32>
    %578 = vector.broadcast %577 : vector<1x32xf32> to vector<10x32xf32>
    %579 = arith.select %576, %578, %547 : vector<10x32xi1>, vector<10x32xf32>
    %580 = vector.shape_cast %574 : vector<10x1xi1> to vector<10x1xi1>
    %581 = vector.broadcast %580 : vector<10x1xi1> to vector<10x32xi1>
    %582 = vector.shape_cast %569 : vector<1x32xf32> to vector<1x32xf32>
    %583 = vector.broadcast %582 : vector<1x32xf32> to vector<10x32xf32>
    %584 = arith.select %581, %583, %552 : vector<10x32xi1>, vector<10x32xf32>
    %585 = vector.shape_cast %574 : vector<10x1xi1> to vector<10x1xi1>
    %586 = vector.broadcast %585 : vector<10x1xi1> to vector<10x32xi1>
    %587 = vector.shape_cast %565 : vector<1x32xf32> to vector<1x32xf32>
    %588 = vector.broadcast %587 : vector<1x32xf32> to vector<10x32xf32>
    %589 = arith.select %586, %588, %557 : vector<10x32xi1>, vector<10x32xf32>
    %cst_116 = arith.constant dense<0.000000e+00> : vector<1x32xf32>
    %590 = tpu.matmul %569, %5, %cst_116 {dimension_numbers = #tpu.dot_dimension_numbers<[1], [0], [0], [1], [0, 0, 1, 1], [], []>} : vector<1x32xf32>, vector<32x32xf32>, vector<1x32xf32> -> vector<1x32xf32>
    %591 = arith.cmpf ogt, %565, %12 : vector<1x32xf32>
    %592 = arith.select %591, %12, %11 : vector<1x32xi1>, vector<1x32xf32>
    %593 = arith.mulf %13, %565 : vector<1x32xf32>
    %594 = vector.extract_strided_slice %362 {offsets = [7, 0], sizes = [1, 32], strides = [1, 1]} : vector<10x32xf32> to vector<1x32xf32>
    %595 = arith.addf %593, %594 : vector<1x32xf32>
    %596 = arith.addf %595, %590 : vector<1x32xf32>
    %597 = arith.subf %596, %592 : vector<1x32xf32>
    %598 = arith.cmpf ogt, %597, %12 : vector<1x32xf32>
    %cst_117 = arith.constant 1.000000e+00 : f32
    %cst_118 = arith.constant 0.000000e+00 : f32
    %599 = vector.broadcast %cst_117 : f32 to vector<1x32xf32>
    %600 = vector.broadcast %cst_118 : f32 to vector<1x32xf32>
    %601 = arith.select %598, %599, %600 : vector<1x32xi1>, vector<1x32xf32>
    %cst_119 = arith.constant 6.000000e-01 : f32
    %602 = vector.broadcast %cst_119 : f32 to vector<1x32xf32>
    %603 = arith.mulf %602, %572 : vector<1x32xf32>
    %604 = arith.addf %603, %601 : vector<1x32xf32>
    %c7_i32_120 = arith.constant 7 : i32
    %605 = vector.broadcast %c7_i32_120 : i32 to vector<10x1xi32>
    %606 = arith.cmpi eq, %14, %605 : vector<10x1xi32>
    %607 = vector.shape_cast %606 : vector<10x1xi1> to vector<10x1xi1>
    %608 = vector.broadcast %607 : vector<10x1xi1> to vector<10x32xi1>
    %609 = vector.shape_cast %604 : vector<1x32xf32> to vector<1x32xf32>
    %610 = vector.broadcast %609 : vector<1x32xf32> to vector<10x32xf32>
    %611 = arith.select %608, %610, %579 : vector<10x32xi1>, vector<10x32xf32>
    %612 = vector.shape_cast %606 : vector<10x1xi1> to vector<10x1xi1>
    %613 = vector.broadcast %612 : vector<10x1xi1> to vector<10x32xi1>
    %614 = vector.shape_cast %601 : vector<1x32xf32> to vector<1x32xf32>
    %615 = vector.broadcast %614 : vector<1x32xf32> to vector<10x32xf32>
    %616 = arith.select %613, %615, %584 : vector<10x32xi1>, vector<10x32xf32>
    %617 = vector.shape_cast %606 : vector<10x1xi1> to vector<10x1xi1>
    %618 = vector.broadcast %617 : vector<10x1xi1> to vector<10x32xi1>
    %619 = vector.shape_cast %597 : vector<1x32xf32> to vector<1x32xf32>
    %620 = vector.broadcast %619 : vector<1x32xf32> to vector<10x32xf32>
    %621 = arith.select %618, %620, %589 : vector<10x32xi1>, vector<10x32xf32>
    %cst_121 = arith.constant dense<0.000000e+00> : vector<1x32xf32>
    %622 = tpu.matmul %601, %5, %cst_121 {dimension_numbers = #tpu.dot_dimension_numbers<[1], [0], [0], [1], [0, 0, 1, 1], [], []>} : vector<1x32xf32>, vector<32x32xf32>, vector<1x32xf32> -> vector<1x32xf32>
    %623 = arith.cmpf ogt, %597, %12 : vector<1x32xf32>
    %624 = arith.select %623, %12, %11 : vector<1x32xi1>, vector<1x32xf32>
    %625 = arith.mulf %13, %597 : vector<1x32xf32>
    %626 = vector.extract_strided_slice %362 {offsets = [8, 0], sizes = [1, 32], strides = [1, 1]} : vector<10x32xf32> to vector<1x32xf32>
    %627 = arith.addf %625, %626 : vector<1x32xf32>
    %628 = arith.addf %627, %622 : vector<1x32xf32>
    %629 = arith.subf %628, %624 : vector<1x32xf32>
    %630 = arith.cmpf ogt, %629, %12 : vector<1x32xf32>
    %cst_122 = arith.constant 1.000000e+00 : f32
    %cst_123 = arith.constant 0.000000e+00 : f32
    %631 = vector.broadcast %cst_122 : f32 to vector<1x32xf32>
    %632 = vector.broadcast %cst_123 : f32 to vector<1x32xf32>
    %633 = arith.select %630, %631, %632 : vector<1x32xi1>, vector<1x32xf32>
    %cst_124 = arith.constant 6.000000e-01 : f32
    %634 = vector.broadcast %cst_124 : f32 to vector<1x32xf32>
    %635 = arith.mulf %634, %604 : vector<1x32xf32>
    %636 = arith.addf %635, %633 : vector<1x32xf32>
    %c8_i32_125 = arith.constant 8 : i32
    %637 = vector.broadcast %c8_i32_125 : i32 to vector<10x1xi32>
    %638 = arith.cmpi eq, %14, %637 : vector<10x1xi32>
    %639 = vector.shape_cast %638 : vector<10x1xi1> to vector<10x1xi1>
    %640 = vector.broadcast %639 : vector<10x1xi1> to vector<10x32xi1>
    %641 = vector.shape_cast %636 : vector<1x32xf32> to vector<1x32xf32>
    %642 = vector.broadcast %641 : vector<1x32xf32> to vector<10x32xf32>
    %643 = arith.select %640, %642, %611 : vector<10x32xi1>, vector<10x32xf32>
    %644 = vector.shape_cast %638 : vector<10x1xi1> to vector<10x1xi1>
    %645 = vector.broadcast %644 : vector<10x1xi1> to vector<10x32xi1>
    %646 = vector.shape_cast %633 : vector<1x32xf32> to vector<1x32xf32>
    %647 = vector.broadcast %646 : vector<1x32xf32> to vector<10x32xf32>
    %648 = arith.select %645, %647, %616 : vector<10x32xi1>, vector<10x32xf32>
    %649 = vector.shape_cast %638 : vector<10x1xi1> to vector<10x1xi1>
    %650 = vector.broadcast %649 : vector<10x1xi1> to vector<10x32xi1>
    %651 = vector.shape_cast %629 : vector<1x32xf32> to vector<1x32xf32>
    %652 = vector.broadcast %651 : vector<1x32xf32> to vector<10x32xf32>
    %653 = arith.select %650, %652, %621 : vector<10x32xi1>, vector<10x32xf32>
    %cst_126 = arith.constant dense<0.000000e+00> : vector<1x32xf32>
    %654 = tpu.matmul %633, %5, %cst_126 {dimension_numbers = #tpu.dot_dimension_numbers<[1], [0], [0], [1], [0, 0, 1, 1], [], []>} : vector<1x32xf32>, vector<32x32xf32>, vector<1x32xf32> -> vector<1x32xf32>
    %655 = arith.cmpf ogt, %629, %12 : vector<1x32xf32>
    %656 = arith.select %655, %12, %11 : vector<1x32xi1>, vector<1x32xf32>
    %657 = arith.mulf %13, %629 : vector<1x32xf32>
    %658 = vector.extract_strided_slice %362 {offsets = [9, 0], sizes = [1, 32], strides = [1, 1]} : vector<10x32xf32> to vector<1x32xf32>
    %659 = arith.addf %657, %658 : vector<1x32xf32>
    %660 = arith.addf %659, %654 : vector<1x32xf32>
    %661 = arith.subf %660, %656 : vector<1x32xf32>
    %662 = arith.cmpf ogt, %661, %12 : vector<1x32xf32>
    %cst_127 = arith.constant 1.000000e+00 : f32
    %cst_128 = arith.constant 0.000000e+00 : f32
    %663 = vector.broadcast %cst_127 : f32 to vector<1x32xf32>
    %664 = vector.broadcast %cst_128 : f32 to vector<1x32xf32>
    %665 = arith.select %662, %663, %664 : vector<1x32xi1>, vector<1x32xf32>
    %cst_129 = arith.constant 6.000000e-01 : f32
    %666 = vector.broadcast %cst_129 : f32 to vector<1x32xf32>
    %667 = arith.mulf %666, %636 : vector<1x32xf32>
    %668 = arith.addf %667, %665 : vector<1x32xf32>
    %c9_i32_130 = arith.constant 9 : i32
    %669 = vector.broadcast %c9_i32_130 : i32 to vector<10x1xi32>
    %670 = arith.cmpi eq, %14, %669 : vector<10x1xi32>
    %671 = vector.shape_cast %670 : vector<10x1xi1> to vector<10x1xi1>
    %672 = vector.broadcast %671 : vector<10x1xi1> to vector<10x32xi1>
    %673 = vector.shape_cast %668 : vector<1x32xf32> to vector<1x32xf32>
    %674 = vector.broadcast %673 : vector<1x32xf32> to vector<10x32xf32>
    %675 = arith.select %672, %674, %643 : vector<10x32xi1>, vector<10x32xf32>
    %676 = vector.shape_cast %670 : vector<10x1xi1> to vector<10x1xi1>
    %677 = vector.broadcast %676 : vector<10x1xi1> to vector<10x32xi1>
    %678 = vector.shape_cast %665 : vector<1x32xf32> to vector<1x32xf32>
    %679 = vector.broadcast %678 : vector<1x32xf32> to vector<10x32xf32>
    %680 = arith.select %677, %679, %648 : vector<10x32xi1>, vector<10x32xf32>
    %681 = vector.shape_cast %670 : vector<10x1xi1> to vector<10x1xi1>
    %682 = vector.broadcast %681 : vector<10x1xi1> to vector<10x32xi1>
    %683 = vector.shape_cast %661 : vector<1x32xf32> to vector<1x32xf32>
    %684 = vector.broadcast %683 : vector<1x32xf32> to vector<10x32xf32>
    %685 = arith.select %682, %684, %653 : vector<10x32xi1>, vector<10x32xf32>
    %c1_131 = arith.constant 1 : index
    %c0_132 = arith.constant 0 : index
    %c0_133 = arith.constant 0 : index
    %686 = vector.load %arg10[%c1_131, %c0_132, %c0_133] : memref<2x10x32xf32, #tpu.memory_space<vmem>>, vector<1x10x32xf32>
    %687 = vector.shape_cast %686 : vector<1x10x32xf32> to vector<10x32xf32>
    %688 = vector.shape_cast %675 : vector<10x32xf32> to vector<1x10x32xf32>
    tpu.vector_store %arg10[%c1_131, %c0_132, %c0_133], %688 {strides = array<i32>} : memref<2x10x32xf32, #tpu.memory_space<vmem>>, vector<1x10x32xf32>,
    %c1_134 = arith.constant 1 : index
    %c0_135 = arith.constant 0 : index
    %c0_136 = arith.constant 0 : index
    %689 = vector.load %arg11[%c1_134, %c0_135, %c0_136] : memref<2x10x32xf32, #tpu.memory_space<vmem>>, vector<1x10x32xf32>
    %690 = vector.shape_cast %689 : vector<1x10x32xf32> to vector<10x32xf32>
    %691 = vector.shape_cast %680 : vector<10x32xf32> to vector<1x10x32xf32>
    tpu.vector_store %arg11[%c1_134, %c0_135, %c0_136], %691 {strides = array<i32>} : memref<2x10x32xf32, #tpu.memory_space<vmem>>, vector<1x10x32xf32>,
    %c1_137 = arith.constant 1 : index
    %c0_138 = arith.constant 0 : index
    %c0_139 = arith.constant 0 : index
    %692 = vector.load %arg12[%c1_137, %c0_138, %c0_139] : memref<2x10x32xf32, #tpu.memory_space<vmem>>, vector<1x10x32xf32>
    %693 = vector.shape_cast %692 : vector<1x10x32xf32> to vector<10x32xf32>
    %694 = vector.shape_cast %685 : vector<10x32xf32> to vector<1x10x32xf32>
    tpu.vector_store %arg12[%c1_137, %c0_138, %c0_139], %694 {strides = array<i32>} : memref<2x10x32xf32, #tpu.memory_space<vmem>>, vector<1x10x32xf32>,
    %cst_140 = arith.constant dense<0.000000e+00> : vector<10x4xf32>
    %695 = tpu.matmul %675, %6, %cst_140 {dimension_numbers = #tpu.dot_dimension_numbers<[1], [0], [0], [1], [0, 0, 1, 1], [], []>} : vector<10x32xf32>, vector<32x4xf32>, vector<10x4xf32> -> vector<10x4xf32>
    %696 = vector.broadcast %10 : vector<1x4xf32> to vector<10x4xf32>
    %697 = arith.addf %695, %696 : vector<10x4xf32>
    %c1_141 = arith.constant 1 : index
    %c0_142 = arith.constant 0 : index
    %c0_143 = arith.constant 0 : index
    %698 = vector.load %arg9[%c1_141, %c0_142, %c0_143] : memref<2x10x4xf32, #tpu.memory_space<vmem>>, vector<1x10x4xf32>
    %699 = vector.shape_cast %698 : vector<1x10x4xf32> to vector<10x4xf32>
    %700 = vector.shape_cast %697 : vector<10x4xf32> to vector<1x10x4xf32>
    tpu.vector_store %arg9[%c1_141, %c0_142, %c0_143], %700 {strides = array<i32>} : memref<2x10x4xf32, #tpu.memory_space<vmem>>, vector<1x10x4xf32>,
    return
  }
}

</mosaic_0001>

<bundles_post_ra>
// kernel: tpu_custom_call.1
= control target key start
LH: loop header
LB: loop body
LE: loop exit
PB: predicated region body
PF: predicated region fallthrough
CT: control target
= control target key end

     0   :  { %vm75_vm0 = vcmask 1043456   ;;  %vm68_vm1 = vcmask 31744   ;;  %v2867_v0 = vmov 0.0   ;;  %vm2868_vm2 = vmmov 0   ;;  %s2869_s16 = smov 0.0   ;;  %s2870_s24 = smov 1.0   ;;  %s3711_s3 = inlined_call_operand.vmem [shape: f32[4,32], index: 3, kind: input, shape index: {}]   ;;  %s3712_s5 = inlined_call_operand.vmem [shape: f32[32,32], index: 5, kind: input, shape index: {}]   ;;  %s3713_s2 = inlined_call_operand.vmem [shape: f32[2,10,4], index: 2, kind: input, shape index: {}]   ;;  %s3714_s0 = inlined_call_operand.<no memory space> [shape: f32[1], index: 0, kind: input, shape index: {}]   ;;  %s3715_s4 = inlined_call_operand.vmem [shape: f32[1,32], index: 4, kind: input, shape index: {}]   ;;  %s3716_s6 = inlined_call_operand.vmem [shape: f32[1,32], index: 6, kind: input, shape index: {}]   ;;  %s3717_s1 = inlined_call_operand.<no memory space> [shape: f32[1], index: 1, kind: input, shape index: {}]   ;;  %s3718_s12 = inlined_call_operand.vmem [shape: f32[2,10,32], index: 12, kind: output, shape index: {3}]   ;;  %s3719_s11 = inlined_call_operand.vmem [shape: f32[2,10,32], index: 11, kind: output, shape index: {2}]   ;;  %s3720_s10 = inlined_call_operand.vmem [shape: f32[2,10,32], index: 10, kind: output, shape index: {1}]   ;;  %s3721_s7 = inlined_call_operand.vmem [shape: f32[32,4], index: 7, kind: input, shape index: {}]   ;;  %s3722_s8 = inlined_call_operand.vmem [shape: f32[1,4], index: 8, kind: input, shape index: {}]   ;;  %s3723_s9 = inlined_call_operand.vmem [shape: f32[2,10,4], index: 9, kind: output, shape index: {0}]  }
   0x1   :  { %2623 = vmatprep.subr.mxu1 %v2867_v0  ;;  %v2940_v1 = vld [vmem:[%s3711_s3] sm:$0xf]  ;;  %v2945_v2 = vld [vmem:[%s3712_s5 + $0x18] sm:$0xff]  ;;  %2631 = vmatprep.mubr.msk.f32.mxu1 %vm2868_vm2, %v2867_v0  ;;  %v61_v4 = vld [vmem:[%s3713_s2 + $0x8] sm:$0x3]  ;;  %v57_v8 = vlaneseq  ;;  %s39_s19 = smax.f32 %s2869_s16, %s3714_s0  ;;  %v3027_v16 = vstv %s3717_s1  ;;  %vm154_vm4 = vcmask 261120  }
   0x2   :  { %v60_v3 = vld [vmem:[%s3713_s2] sm:$0xff]  ;;  %2618 = vmatprep.subr.msk.mxu0 %vm75_vm0, %v2940_v1  ;;  %2624 = vmatpush3.msra.mxu1 %v2945_v2  ;;  %v2961_v5 = vld [vmem:[%s3712_s5 + $0x10] sm:$0xff]  ;;  %v2971_v6 = vld [vmem:[%s3712_s5 + $0x8] sm:$0xff]  ;;  %s40_s25 = smin.f32 %s2870_s24, %s39_s19  ;;  %vm2468_vm3 = vcmp.lt.f32.partialorder %v3027_v16, 0.0 }
   0x3   :  { %2619 = vmatpush3.msk.msra.mxu0 %vm75_vm0, %v2940_v1  ;;  %2620 = vmatprep.mubr.msk.f32.mxu0 %vm68_vm1, %v60_v3  ;;  %v2979_v7 = vld [vmem:[%s3712_s5] sm:$0xff]  ;;  %v3009_v9 = vshrl.u32 %v57_v8, 7  ;;  %v3020_v14 = vstv %s40_s25  ;;  %v3044_v23 = vsel %vm2468_vm3, %v3027_v16, 0.0 }
   0x4   :  { %2625 = vmatprep.subr.mxu1 %v2867_v0  ;;  %2621 = vmatmul.mubr.msk.f32.vlgmr.msra.gmra.mxu0 %vm68_vm1, %v61_v4  ;;  %v51_v10 = vld [vmem:[%s3715_s4] sm:$0x1]  ;;  %v3033_v18 = vmul.f32 0.0, %v3020_v14 }
   0x5   :  { %2626 = vmatpush3.msra.mxu1 %v2961_v5  ;;  %2634 = vmatprep.subr.mxu0 %v2867_v0  ;;  %v52_v11 = vld [vmem:[%s3716_s6] sm:$0x1]  ;;  %v3018_v13 = vsub.s32 0, %v3009_v9  ;;  %vm237_vm6 = vcmp.eq.s32.totalorder %v3009_v9, 0  ;;  %vm346_vm7 = vcmp.eq.s32.totalorder %v3009_v9, 1  ;;  %vm454_vm9 = vcmp.eq.s32.totalorder %v3009_v9, 2 }
   0x6   :  { %2627 = vmatprep.subr.mxu1 %v2867_v0  ;;  %2635 = vmatpush3.msra.mxu0 %v2945_v2  ;;  %v53_v12 = vadd.f32 %v52_v11, %v51_v10  ;;  %vm562_vm11 = vcmp.eq.s32.totalorder %v3009_v9, 3  ;;  %vm670_vm13 = vcmp.eq.s32.totalorder %v3009_v9, 4  ;;  %vm778_vm15 = vcmp.eq.s32.totalorder %v3009_v9, 5 }
   0x7   :  { %2628 = vmatpush3.msra.mxu1 %v2971_v6  ;;  %2636 = vmatprep.subr.mxu0 %v2867_v0 }
   0x8   :  { %2629 = vmatprep.subr.mxu1 %v2867_v0  ;;  %2637 = vmatpush3.msra.mxu0 %v2961_v5  ;;  %v3030_v17 = vrot.slane %v53_v12, %v3018_v13 }
   0x9   :  { %2630 = vmatpush3.msra.mxu1 %v2979_v7  ;;  %2638 = vmatprep.subr.mxu0 %v2867_v0 }
   0xa   :  { %2632 = vmatmul.mubr.f32.vlgmr.msra.gmra.mxu1 %v2867_v0  ;;  %2639 = vmatpush3.msra.mxu0 %v2971_v6 }
   0xb   :  { %2640 = vmatprep.subr.mxu0 %v2867_v0  ;;  %2642 = vmatprep.mubr.msk.f32.mxu0 %vm2868_vm2, %v2867_v0 }
   0xc   :  { %2641 = vmatpush3.msra.mxu0 %v2979_v7  ;;  %2645 = vmatprep.subr.mxu1 %v2867_v0 }
   0xd   :  { %2646 = vmatpush3.msra.mxu1 %v2945_v2  ;;  %2653 = vmatprep.mubr.msk.f32.mxu1 %vm2868_vm2, %v2867_v0 }
   0xe   :  { %2647 = vmatprep.subr.mxu1 %v2867_v0  ;;  %2656 = vmatprep.subr.mxu0 %v2867_v0 }
   0xf   :  { %2648 = vmatpush3.msra.mxu1 %v2961_v5 }
  0x10   :  { %2649 = vmatprep.subr.mxu1 %v2867_v0 }
  0x11   :  { %2650 = vmatpush3.msra.mxu1 %v2971_v6 }
  0x12   :  { %2651 = vmatprep.subr.mxu1 %v2867_v0 }
  0x13   :  { %2652 = vmatpush3.msra.mxu1 %v2979_v7 }
  0x14   :  { %2667 = vmatprep.subr.mxu1 %v2867_v0 }
  0xc4   :  { %v3022_v15 = vpop.f32.mrf.mxu0 }
  0xc6   :  { %v145_v19 = vpop.f32.mrf.mxu0 }
  0xc7   :  { %v3036_v20 = vadd.f32 %v145_v19, %v3030_v17 }
  0xc9   :  { %v231_v21 = vadd.f32 %v3033_v18, %v3036_v20  ;;  %v337_v28 = vrot.slane %v3036_v20, 1  ;;  %v445_v38 = vrot.slane %v3036_v20, 2  ;;  %v553_v57 = vrot.slane %v3036_v20, 3 }
  0xca   :  { %v3041_v22 = vpop.f32.mrf.mxu1 }
  0xcb   :  { %v232_v24 = vadd.f32 %v231_v21, %v3041_v22 }
  0xcc   :  { %v2633_v25 = vpop.f32.mrf.mxu1 }
  0xcd   :  { %v233_v26 = vsub.f32 %v232_v24, %v3044_v23 }
  0xcf   :  { %vm234_vm5 = vcmp.gt.f32.partialorder %v233_v26, %v3027_v16  ;;  %v335_v27 = vmul.f32 %v233_v26, %v3020_v14  ;;  %v258_v33 = vrot.slane %v233_v26, %v3018_v13  ;;  %v661_v26 = vrot.slane %v3036_v20, 4 }
  0xd0   :  { %v235_v29 = vsel %vm234_vm5, 1.0, %v2867_v0  ;;  %v334_v34 = vsel %vm234_vm5, %v3027_v16, 0.0  ;;  %vm886_vm5 = vcmp.eq.s32.totalorder %v3009_v9, 6 }
  0xd1   :  { %2643 = vmatmul.mubr.msk.f32.vlgmr.msra.gmra.mxu0 %vm154_vm4, %v235_v29  ;;  %v339_v30 = vadd.f32 %v337_v28, %v335_v27  ;;  %v246_v37 = vrot.slane %v235_v29, %v3018_v13  ;;  %v344_v39 = vmul.f32 0.6, %v235_v29  ;;  %v259_v42 = vsel %vm237_vm6, %v258_v33, 0.0 }
  0xd2   :  { %2657 = vmatpush3.msra.mxu0 %v2945_v2  ;;  %2664 = vmatprep.mubr.msk.f32.mxu0 %vm2868_vm2, %v2867_v0 }
  0xd3   :  { %2658 = vmatprep.subr.mxu0 %v2867_v0  ;;  %v247_v48 = vsel %vm237_vm6, %v246_v37, 0.0 }
  0xd4   :  { %2659 = vmatpush3.msra.mxu0 %v2961_v5 }
  0xd5   :  { %2660 = vmatprep.subr.mxu0 %v2867_v0 }
  0xd6   :  { %2661 = vmatpush3.msra.mxu0 %v2971_v6 }
  0xd7   :  { %2662 = vmatprep.subr.mxu0 %v2867_v0 }
  0xd8   :  { %2663 = vmatpush3.msra.mxu0 %v2979_v7 }
  0xd9   :  { %2678 = vmatprep.subr.mxu0 %v2867_v0 }
 0x191   :  { %v330_v31 = vpop.f32.mrf.mxu0 }
 0x192   :  { %v340_v32 = vadd.f32 %v339_v30, %v330_v31 }
 0x193   :  { %v2644_v35 = vpop.f32.mrf.mxu0 }
 0x194   :  { %v341_v36 = vsub.f32 %v340_v32, %v334_v34 }
 0x196   :  { %v367_v40 = vrot.slane %v341_v36, %v3018_v13  ;;  %vm342_vm8 = vcmp.gt.f32.partialorder %v341_v36, %v3027_v16  ;;  %v444_v41 = vmul.f32 %v341_v36, %v3020_v14 }
 0x197   :  { %v343_v43 = vsel %vm342_vm8, 1.0, %v2867_v0  ;;  %v443_v54 = vsel %vm342_vm8, %v3027_v16, 0.0 }
 0x198   :  { %v368_v44 = vsel %vm346_vm7, %v367_v40, %v259_v42  ;;  %v345_v45 = vadd.f32 %v344_v39, %v343_v43  ;;  %v361_v46 = vrot.slane %v343_v43, %v3018_v13  ;;  %2654 = vmatmul.mubr.msk.f32.vlgmr.msra.gmra.mxu1 %vm154_vm4, %v343_v43  ;;  %v447_v47 = vadd.f32 %v445_v38, %v444_v41 }
 0x199   :  { %2668 = vmatpush3.msra.mxu1 %v2945_v2  ;;  %2675 = vmatprep.mubr.msk.f32.mxu1 %vm2868_vm2, %v2867_v0  ;;  %v769_v43 = vrot.slane %v3036_v20, 5 }
 0x19a   :  { %v355_v49 = vrot.slane %v345_v45, %v3018_v13  ;;  %v362_v50 = vsel %vm346_vm7, %v361_v46, %v247_v48  ;;  %2669 = vmatprep.subr.mxu1 %v2867_v0  ;;  %v452_v59 = vmul.f32 0.6, %v345_v45 }
 0x19b   :  { %2670 = vmatpush3.msra.mxu1 %v2961_v5 }
 0x19c   :  { %v356_v51 = vsel %vm346_vm7, %v355_v49, %v247_v48  ;;  %2671 = vmatprep.subr.mxu1 %v2867_v0 }
 0x19d   :  { %2672 = vmatpush3.msra.mxu1 %v2971_v6 }
 0x19e   :  { %2673 = vmatprep.subr.mxu1 %v2867_v0 }
 0x19f   :  { %2674 = vmatpush3.msra.mxu1 %v2979_v7 }
 0x1a0   :  { %2689 = vmatprep.subr.mxu1 %v2867_v0 }
 0x258   :  { %v439_v52 = vpop.f32.mrf.mxu1 }
 0x259   :  { %v448_v53 = vadd.f32 %v447_v47, %v439_v52 }
 0x25a   :  { %v2655_v55 = vpop.f32.mrf.mxu1 }
 0x25b   :  { %v449_v56 = vsub.f32 %v448_v53, %v443_v54 }
 0x25d   :  { %v475_v58 = vrot.slane %v449_v56, %v3018_v13  ;;  %vm450_vm10 = vcmp.gt.f32.partialorder %v449_v56, %v3027_v16  ;;  %v552_v60 = vmul.f32 %v449_v56, %v3020_v14 }
 0x25e   :  { %v451_v61 = vsel %vm450_vm10, 1.0, %v2867_v0  ;;  %v551_v21 = vsel %vm450_vm10, %v3027_v16, 0.0  ;;  %vm994_vm10 = vcmp.eq.s32.totalorder %v3009_v9, 7 }
 0x25f   :  { %v476_v62 = vsel %vm454_vm9, %v475_v58, %v368_v44  ;;  %v453_v63 = vadd.f32 %v452_v59, %v451_v61  ;;  %v469_v3 = vrot.slane %v451_v61, %v3018_v13  ;;  %2665 = vmatmul.mubr.msk.f32.vlgmr.msra.gmra.mxu0 %vm154_vm4, %v451_v61  ;;  %v555_v4 = vadd.f32 %v553_v57, %v552_v60 }
 0x260   :  { %2679 = vmatpush3.msra.mxu0 %v2945_v2  ;;  %2686 = vmatprep.mubr.msk.f32.mxu0 %vm2868_vm2, %v2867_v0  ;;  %v877_v60 = vrot.slane %v3036_v20, 6 }
 0x261   :  { %v463_v8 = vrot.slane %v453_v63, %v3018_v13  ;;  %v470_v10 = vsel %vm454_vm9, %v469_v3, %v362_v50  ;;  %2680 = vmatprep.subr.mxu0 %v2867_v0  ;;  %v560_v28 = vmul.f32 0.6, %v453_v63 }
 0x262   :  { %2681 = vmatpush3.msra.mxu0 %v2961_v5 }
 0x263   :  { %v464_v11 = vsel %vm454_vm9, %v463_v8, %v356_v51  ;;  %2682 = vmatprep.subr.mxu0 %v2867_v0 }
 0x264   :  { %2683 = vmatpush3.msra.mxu0 %v2971_v6 }
 0x265   :  { %2684 = vmatprep.subr.mxu0 %v2867_v0 }
 0x266   :  { %2685 = vmatpush3.msra.mxu0 %v2979_v7 }
 0x267   :  { %2700 = vmatprep.subr.mxu0 %v2867_v0 }
 0x31f   :  { %v547_v12 = vpop.f32.mrf.mxu0 }
 0x320   :  { %v556_v19 = vadd.f32 %v555_v4, %v547_v12 }
 0x321   :  { %v2666_v24 = vpop.f32.mrf.mxu0 }
 0x322   :  { %v557_v25 = vsub.f32 %v556_v19, %v551_v21 }
 0x324   :  { %v583_v27 = vrot.slane %v557_v25, %v3018_v13  ;;  %vm558_vm12 = vcmp.gt.f32.partialorder %v557_v25, %v3027_v16  ;;  %v660_v29 = vmul.f32 %v557_v25, %v3020_v14 }
 0x325   :  { %v559_v30 = vsel %vm558_vm12, 1.0, %v2867_v0  ;;  %v659_v40 = vsel %vm558_vm12, %v3027_v16, 0.0 }
 0x326   :  { %v584_v31 = vsel %vm562_vm11, %v583_v27, %v476_v62  ;;  %v561_v32 = vadd.f32 %v560_v28, %v559_v30  ;;  %v577_v33 = vrot.slane %v559_v30, %v3018_v13  ;;  %2676 = vmatmul.mubr.msk.f32.vlgmr.msra.gmra.mxu1 %vm154_vm4, %v559_v30  ;;  %v663_v34 = vadd.f32 %v661_v26, %v660_v29 }
 0x327   :  { %2690 = vmatpush3.msra.mxu1 %v2945_v2  ;;  %2697 = vmatprep.mubr.msk.f32.mxu1 %vm2868_vm2, %v2867_v0  ;;  %v985_v29 = vrot.slane %v3036_v20, 7 }
 0x328   :  { %v571_v35 = vrot.slane %v561_v32, %v3018_v13  ;;  %v578_v36 = vsel %vm562_vm11, %v577_v33, %v470_v10  ;;  %2691 = vmatprep.subr.mxu1 %v2867_v0  ;;  %v668_v45 = vmul.f32 0.6, %v561_v32 }
 0x329   :  { %2692 = vmatpush3.msra.mxu1 %v2961_v5 }
 0x32a   :  { %2693 = vmatprep.subr.mxu1 %v2867_v0  ;;  %v572_v37 = vsel %vm562_vm11, %v571_v35, %v464_v11 }
 0x32b   :  { %2694 = vmatpush3.msra.mxu1 %v2971_v6 }
 0x32c   :  { %2695 = vmatprep.subr.mxu1 %v2867_v0 }
 0x32d   :  { %2696 = vmatpush3.msra.mxu1 %v2979_v7 }
 0x32e   :  { %2711 = vmatprep.subr.mxu1 %v2867_v0 }
 0x3e6   :  { %v655_v38 = vpop.f32.mrf.mxu1 }
 0x3e7   :  { %v664_v39 = vadd.f32 %v663_v34, %v655_v38 }
 0x3e8   :  { %v2677_v41 = vpop.f32.mrf.mxu1 }
 0x3e9   :  { %v665_v42 = vsub.f32 %v664_v39, %v659_v40 }
 0x3eb   :  { %v691_v44 = vrot.slane %v665_v42, %v3018_v13  ;;  %vm666_vm14 = vcmp.gt.f32.partialorder %v665_v42, %v3027_v16  ;;  %v768_v46 = vmul.f32 %v665_v42, %v3020_v14 }
 0x3ec   :  { %v667_v47 = vsel %vm666_vm14, 1.0, %v2867_v0  ;;  %v767_v57 = vsel %vm666_vm14, %v3027_v16, 0.0 }
 0x3ed   :  { %v692_v48 = vsel %vm670_vm13, %v691_v44, %v584_v31  ;;  %v669_v49 = vadd.f32 %v668_v45, %v667_v47  ;;  %v685_v50 = vrot.slane %v667_v47, %v3018_v13  ;;  %2687 = vmatmul.mubr.msk.f32.vlgmr.msra.gmra.mxu0 %vm154_vm4, %v667_v47  ;;  %v771_v51 = vadd.f32 %v769_v43, %v768_v46 }
 0x3ee   :  { %2701 = vmatpush3.msra.mxu0 %v2945_v2  ;;  %2708 = vmatprep.mubr.msk.f32.mxu0 %vm2868_vm2, %v2867_v0 }
 0x3ef   :  { %v679_v52 = vrot.slane %v669_v49, %v3018_v13  ;;  %v686_v53 = vsel %vm670_vm13, %v685_v50, %v578_v36  ;;  %2702 = vmatprep.subr.mxu0 %v2867_v0  ;;  %v776_v62 = vmul.f32 0.6, %v669_v49 }
 0x3f0   :  { %2703 = vmatpush3.msra.mxu0 %v2961_v5 }
 0x3f1   :  { %2704 = vmatprep.subr.mxu0 %v2867_v0  ;;  %v680_v54 = vsel %vm670_vm13, %v679_v52, %v572_v37 }
 0x3f2   :  { %2705 = vmatpush3.msra.mxu0 %v2971_v6 }
 0x3f3   :  { %2706 = vmatprep.subr.mxu0 %v2867_v0 }
 0x3f4   :  { %2707 = vmatpush3.msra.mxu0 %v2979_v7 }
 0x3f5   :  { %2722 = vmatprep.subr.mxu0 %v2867_v0 }
 0x4ad   :  { %v763_v55 = vpop.f32.mrf.mxu0 }
 0x4ae   :  { %v772_v56 = vadd.f32 %v771_v51, %v763_v55  ;;  %v151_v55 = vadd.f32 %v3022_v15, %v3030_v17 }
 0x4af   :  { %v2688_v58 = vpop.f32.mrf.mxu0 }
 0x4b0   :  { %v773_v59 = vsub.f32 %v772_v56, %v767_v57 }
 0x4b2   :  { %v799_v61 = vrot.slane %v773_v59, %v3018_v13  ;;  %vm774_vm3 = vcmp.gt.f32.partialorder %v773_v59, %v3027_v16  ;;  %v876_v63 = vmul.f32 %v773_v59, %v3020_v14 }
 0x4b3   :  { %v775_v3 = vsel %vm774_vm3, 1.0, %v2867_v0  ;;  %v875_v26 = vsel %vm774_vm3, %v3027_v16, 0.0 }
 0x4b4   :  { %v800_v4 = vsel %vm778_vm15, %v799_v61, %v692_v48  ;;  %v777_v8 = vadd.f32 %v776_v62, %v775_v3  ;;  %v793_v10 = vrot.slane %v775_v3, %v3018_v13  ;;  %2698 = vmatmul.mubr.msk.f32.vlgmr.msra.gmra.mxu1 %vm154_vm4, %v775_v3  ;;  %v879_v11 = vadd.f32 %v877_v60, %v876_v63  ;;  %v2481_v63 = vld [vmem:[%s3713_s2 + $0x10] sm:$0xff] }
 0x4b5   :  { %2712 = vmatpush3.msra.mxu1 %v2945_v2  ;;  %2719 = vmatprep.mubr.msk.f32.mxu1 %vm2868_vm2, %v2867_v0 }
 0x4b6   :  { %v787_v12 = vrot.slane %v777_v8, %v3018_v13  ;;  %v794_v19 = vsel %vm778_vm15, %v793_v10, %v686_v53  ;;  %2713 = vmatprep.subr.mxu1 %v2867_v0  ;;  %v884_v31 = vmul.f32 0.6, %v777_v8  ;;  %v3325_v8 = vld [vmem:[%s3721_s7 + $0x10] sm:$0xff]  ;;  %v3332_v10 = vld [vmem:[%s3721_s7 + $0x8] sm:$0xff] }
 0x4b7   :  { %2714 = vmatpush3.msra.mxu1 %v2961_v5 }
 0x4b8   :  { %2715 = vmatprep.subr.mxu1 %v2867_v0  ;;  %v788_v21 = vsel %vm778_vm15, %v787_v12, %v680_v54 }
 0x4b9   :  { %2716 = vmatpush3.msra.mxu1 %v2971_v6 }
 0x4ba   :  { %2717 = vmatprep.subr.mxu1 %v2867_v0 }
 0x4bb   :  { %2718 = vmatpush3.msra.mxu1 %v2979_v7 }
 0x574   :  { %v871_v24 = vpop.f32.mrf.mxu1 }
 0x575   :  { %v880_v25 = vadd.f32 %v879_v11, %v871_v24  ;;  %v3339_v11 = vld [vmem:[%s3721_s7] sm:$0xff] }
 0x576   :  { %v2699_v27 = vpop.f32.mrf.mxu1 }
 0x577   :  { %v881_v28 = vsub.f32 %v880_v25, %v875_v26 }
 0x579   :  { %v907_v30 = vrot.slane %v881_v28, %v3018_v13  ;;  %vm882_vm8 = vcmp.gt.f32.partialorder %v881_v28, %v3027_v16  ;;  %v984_v32 = vmul.f32 %v881_v28, %v3020_v14 }
 0x57a   :  { %v883_v33 = vsel %vm882_vm8, 1.0, %v2867_v0  ;;  %v983_v42 = vsel %vm882_vm8, %v3027_v16, 0.0 }
 0x57b   :  { %v908_v34 = vsel %vm886_vm5, %v907_v30, %v800_v4  ;;  %v885_v35 = vadd.f32 %v884_v31, %v883_v33  ;;  %v901_v36 = vrot.slane %v883_v33, %v3018_v13  ;;  %2709 = vmatmul.mubr.msk.f32.vlgmr.msra.gmra.mxu0 %vm154_vm4, %v883_v33  ;;  %v987_v20 = vadd.f32 %v985_v29, %v984_v32  ;;  %v2482_v4 = vld [vmem:[%s3713_s2 + $0x18] sm:$0x3] }
 0x57c   :  { %2723 = vmatpush3.msra.mxu0 %v2945_v2  ;;  %2730 = vmatprep.mubr.msk.f32.mxu0 %vm2868_vm2, %v2867_v0 }
 0x57d   :  { %v895_v37 = vrot.slane %v885_v35, %v3018_v13  ;;  %v902_v38 = vsel %vm886_vm5, %v901_v36, %v794_v19  ;;  %2724 = vmatprep.subr.mxu0 %v2867_v0  ;;  %v992_v46 = vmul.f32 0.6, %v885_v35  ;;  %v1200_v19 = vrot.slane %v151_v55, 1 }
 0x57e   :  { %2725 = vmatpush3.msra.mxu0 %v2961_v5 }
 0x57f   :  { %v896_v39 = vsel %vm886_vm5, %v895_v37, %v788_v21  ;;  %2726 = vmatprep.subr.mxu0 %v2867_v0  ;;  %v3346_v21 = vadd.s32 8, %v3009_v9 }
 0x580   :  { %2727 = vmatpush3.msra.mxu0 %v2971_v6 }
 0x581   :  { %2728 = vmatprep.subr.mxu0 %v2867_v0  ;;  %vm1210_vm3 = vcmp.eq.s32.totalorder %v3346_v21, 9 }
 0x582   :  { %2729 = vmatpush3.msra.mxu0 %v2979_v7 }
 0x583   :  { %2744 = vmatprep.subr.msk.mxu0 %vm75_vm0, %v2940_v1 }
 0x63b   :  { %v979_v40 = vpop.f32.mrf.mxu0 }
 0x63c   :  { %v988_v41 = vadd.f32 %v987_v20, %v979_v40 }
 0x63d   :  { %v2710_v43 = vpop.f32.mrf.mxu0 }
 0x63e   :  { %v989_v44 = vsub.f32 %v988_v41, %v983_v42 }
 0x640   :  { %v1015_v45 = vrot.slane %v989_v44, %v3018_v13  ;;  %vm990_vm12 = vcmp.gt.f32.partialorder %v989_v44, %v3027_v16  ;;  %v1092_v54 = vmul.f32 %v989_v44, %v3020_v14 }
 0x641   :  { %v991_v47 = vsel %vm990_vm12, 1.0, %v2867_v0  ;;  %v1091_v59 = vsel %vm990_vm12, %v3027_v16, 0.0  ;;  %vm1234_vm12 = vcmask 254976  }
 0x642   :  { %v1016_v48 = vsel %vm994_vm10, %v1015_v45, %v908_v34  ;;  %v993_v49 = vadd.f32 %v992_v46, %v991_v47  ;;  %v1009_v50 = vrot.slane %v991_v47, %v3018_v13  ;;  %2720 = vmatmul.mubr.msk.f32.vlgmr.msra.gmra.mxu1 %vm154_vm4, %v991_v47  ;;  %v1093_v56 = vadd.f32 %v1092_v54, %v151_v55 }
 0x643   :  { %1238 = vst.msk [vmem:[%s3718_s12] sm:$0xff] %vm154_vm4, %v1016_v48 }
 0x644   :  { %v1010_v51 = vsel %vm994_vm10, %v1009_v50, %v902_v38  ;;  %v1003_v52 = vrot.slane %v993_v49, %v3018_v13  ;;  %v1098_v62 = vmul.f32 0.6, %v993_v49 }
 0x645   :  { %1236 = vst.msk [vmem:[%s3719_s11] sm:$0xff] %vm154_vm4, %v1010_v51  ;;  %v3425_v51 = vld [vmem:[%s3722_s8] ss:$0 sm:$0xff] }
 0x646   :  { %v1004_v53 = vsel %vm994_vm10, %v1003_v52, %v896_v39 }
 0x647   :  { %1233 = vst.msk [vmem:[%s3720_s10] sm:$0xff] %vm154_vm4, %v1004_v53  ;;  %2741 = vmatprep.mubr.msk.f32.mxu1 %vm154_vm4, %v1004_v53 }
 0x702   :  { %v1087_v57 = vpop.f32.mrf.mxu1 }
 0x703   :  { %v1094_v58 = vadd.f32 %v1093_v56, %v1087_v57 }
 0x704   :  { %v2721_v60 = vpop.f32.mrf.mxu1 }
 0x705   :  { %v1095_v61 = vsub.f32 %v1094_v58, %v1091_v59 }
 0x707   :  { %vm1096_vm14 = vcmp.gt.f32.partialorder %v1095_v61, %v3027_v16  ;;  %v1198_v12 = vmul.f32 %v1095_v61, %v3020_v14  ;;  %v1121_v27 = vrot.slane %v1095_v61, %v3018_v13 }
 0x708   :  { %v1097_v15 = vsel %vm1096_vm14, 1.0, %v2867_v0  ;;  %v1197_v28 = vsel %vm1096_vm14, %v3027_v16, 0.0 }
 0x709   :  { %v1099_v3 = vadd.f32 %v1098_v62, %v1097_v15  ;;  %2731 = vmatmul.mubr.msk.f32.vlgmr.msra.gmra.mxu0 %vm154_vm4, %v1097_v15  ;;  %v1202_v24 = vadd.f32 %v1200_v19, %v1198_v12  ;;  %v1115_v31 = vrot.slane %v1097_v15, %v3018_v13 }
 0x70a   :  { %2745 = vmatpush3.msk.msra.mxu0 %vm75_vm0, %v2940_v1  ;;  %2746 = vmatprep.mubr.msk.f32.mxu0 %vm68_vm1, %v2481_v63  ;;  %v3318_v1 = vld [vmem:[%s3721_s7 + $0x18] sm:$0xff]  ;;  %vm1101_vm0 = vcmp.eq.s32.totalorder %v3346_v21, 8 }
 0x70b   :  { %2749 = vmatprep.subr.mxu0 %v2867_v0  ;;  %2733 = vmatprep.subr.mxu1 %v3318_v1  ;;  %v1207_v33 = vmul.f32 0.6, %v1099_v3  ;;  %v1123_v35 = vsel %vm1101_vm0, %v1121_v27, 0.0  ;;  %v1109_v37 = vrot.slane %v1099_v3, %v3018_v13  ;;  %v1117_v41 = vsel %vm1101_vm0, %v1115_v31, 0.0 }
 0x70c   :  { %2734 = vmatpush3.msra.mxu1 %v3318_v1 }
 0x70d   :  { %2747 = vmatmul.mubr.msk.f32.vlgmr.msra.gmra.mxu0 %vm68_vm1, %v2482_v4  ;;  %2735 = vmatprep.subr.mxu1 %v3325_v8  ;;  %v1111_v45 = vsel %vm1101_vm0, %v1109_v37, 0.0 }
 0x70e   :  { %2750 = vmatpush3.msra.mxu0 %v2945_v2  ;;  %2757 = vmatprep.mubr.msk.f32.mxu0 %vm2868_vm2, %v2867_v0 }
 0x70f   :  { %2751 = vmatprep.subr.mxu0 %v2867_v0  ;;  %2736 = vmatpush3.msra.mxu1 %v3325_v8 }
 0x710   :  { %2752 = vmatpush3.msra.mxu0 %v2961_v5  ;;  %2737 = vmatprep.subr.mxu1 %v3332_v10 }
 0x711   :  { %2753 = vmatprep.subr.mxu0 %v2867_v0  ;;  %2738 = vmatpush3.msra.mxu1 %v3332_v10 }
 0x712   :  { %2754 = vmatpush3.msra.mxu0 %v2971_v6  ;;  %2739 = vmatprep.subr.mxu1 %v3339_v11 }
 0x713   :  { %2755 = vmatprep.subr.mxu0 %v2867_v0  ;;  %2740 = vmatpush3.msra.mxu1 %v3339_v11 }
 0x714   :  { %2756 = vmatpush3.msra.mxu0 %v2979_v7  ;;  %2760 = vmatprep.subr.mxu1 %v2867_v0 }
 0x715   :  { %2771 = vmatprep.subr.mxu0 %v2867_v0 }
 0x7c9   :  { %v1193_v25 = vpop.f32.mrf.mxu0 }
 0x7ca   :  { %v1203_v26 = vadd.f32 %v1202_v24, %v1193_v25 }
 0x7cb   :  { %v2732_v29 = vpop.f32.mrf.mxu0 }
 0x7cc   :  { %v1204_v30 = vsub.f32 %v1203_v26, %v1197_v28 }
 0x7cd   :  { %v3355_v32 = vpop.f32.mrf.mxu0 }
 0x7ce   :  { %vm1205_vm8 = vcmp.gt.f32.partialorder %v1204_v30, %v3027_v16  ;;  %v1230_v34 = vrot.slane %v1204_v30, %v3018_v13  ;;  %v1411_v9 = vadd.f32 %v3355_v32, %v3030_v17 }
 0x7cf   :  { %v1206_v36 = vsel %vm1205_vm8, 1.0, %v2867_v0  ;;  %v1405_v20 = vpop.f32.mrf.mxu0  ;;  %vm3724_vm8 = vcmask 25600  }
 0x7d0   :  { %v1208_v38 = vadd.f32 %v1207_v33, %v1206_v36  ;;  %v1224_v39 = vrot.slane %v1206_v36, %v3018_v13  ;;  %v1232_v40 = vsel %vm1210_vm3, %v1230_v34, %v1123_v35  ;;  %v3373_v42 = vadd.f32 %v1405_v20, %v3030_v17 }
 0x7d1   :  { %1239 = vst.msk [vmem:[%s3718_s12 + $0x8] sm:$0x3] %vm1234_vm12, %v1232_v40  ;;  %v2329_v17 = vrot.slane %v1411_v9, 1 }
 0x7d2   :  { %v1218_v43 = vrot.slane %v1208_v38, %v3018_v13  ;;  %v1226_v44 = vsel %vm1210_vm3, %v1224_v39, %v1117_v41  ;;  %v1414_v46 = vadd.f32 %v3373_v42, %v3033_v18  ;;  %v1514_v50 = vrot.slane %v3373_v42, 1 }
 0x7d3   :  { %1237 = vst.msk [vmem:[%s3719_s11 + $0x8] sm:$0x3] %vm1234_vm12, %v1226_v44  ;;  %v1616_v63 = vrot.slane %v3373_v42, 2  ;;  %v1718_v37 = vrot.slane %v3373_v42, 3 }
 0x7d4   :  { %v1220_v47 = vsel %vm1210_vm3, %v1218_v43, %v1111_v45  ;;  %v1415_v48 = vadd.f32 %v1414_v46, %v3041_v22 }
 0x7d5   :  { %1235 = vst.msk [vmem:[%s3720_s10 + $0x8] sm:$0x3] %vm1234_vm12, %v1220_v47  ;;  %2742 = vmatmul.mubr.msk.f32.vlgmr.msra.gmra.mxu1 %vm154_vm4, %v1220_v47 }
 0x7d6   :  { %2761 = vmatpush3.msra.mxu1 %v2945_v2  ;;  %2768 = vmatprep.mubr.msk.f32.mxu1 %vm2868_vm2, %v2867_v0  ;;  %v1416_v49 = vsub.f32 %v1415_v48, %v3044_v23 }
 0x7d7   :  { %2762 = vmatprep.subr.mxu1 %v2867_v0 }
 0x7d8   :  { %2763 = vmatpush3.msra.mxu1 %v2961_v5  ;;  %vm1417_vm14 = vcmp.gt.f32.partialorder %v1416_v49, %v3027_v16  ;;  %v1512_v18 = vmul.f32 %v1416_v49, %v3020_v14  ;;  %v1435_v58 = vrot.slane %v1416_v49, %v3018_v13 }
 0x7d9   :  { %2764 = vmatprep.subr.mxu1 %v2867_v0  ;;  %v1418_v22 = vsel %vm1417_vm14, 1.0, %v2867_v0  ;;  %v1511_v59 = vsel %vm1417_vm14, %v3027_v16, 0.0 }
 0x7da   :  { %2765 = vmatpush3.msra.mxu1 %v2971_v6  ;;  %2758 = vmatmul.mubr.msk.f32.vlgmr.msra.gmra.mxu0 %vm154_vm4, %v1418_v22  ;;  %v1516_v23 = vadd.f32 %v1514_v50, %v1512_v18  ;;  %v1423_v62 = vrot.slane %v1418_v22, %v3018_v13  ;;  %v1521_v15 = vmul.f32 0.6, %v1418_v22  ;;  %v1436_v12 = vsel %vm237_vm6, %v1435_v58, 0.0 }
 0x7db   :  { %2766 = vmatprep.subr.mxu1 %v2867_v0  ;;  %2772 = vmatpush3.msra.mxu0 %v2945_v2 }
 0x7dc   :  { %2767 = vmatpush3.msra.mxu1 %v2979_v7  ;;  %2773 = vmatprep.subr.mxu0 %v2867_v0  ;;  %v1424_v28 = vsel %vm237_vm6, %v1423_v62, 0.0 }
 0x7dd   :  { %2779 = vmatprep.mubr.msk.f32.mxu0 %vm2868_vm2, %v2867_v0  ;;  %2774 = vmatpush3.msra.mxu0 %v2961_v5 }
 0x7de   :  { %2782 = vmatprep.subr.mxu1 %v2867_v0  ;;  %2775 = vmatprep.subr.mxu0 %v2867_v0 }
 0x7df   :  { %2776 = vmatpush3.msra.mxu0 %v2971_v6 }
 0x7e0   :  { %2777 = vmatprep.subr.mxu0 %v2867_v0 }
 0x7e1   :  { %2778 = vmatpush3.msra.mxu0 %v2979_v7 }
 0x7e2   :  { %2793 = vmatprep.subr.mxu0 %v2867_v0 }
 0x895   :  { %v2743_v52 = vpop.f32.mrf.mxu1 }
 0x896   :  { %v1324_v53 = vadd.f32 %v2743_v52, %v3425_v51 }
 0x897   :  { %v1318_v54 = vpop.f32.mrf.mxu1 }
 0x898   :  { %1329 = vst.msk [vmem:[%s3723_s9 + $0x8] sm:$0x3] %vm3724_vm8, %v1324_v53  ;;  %v1319_v55 = vadd.f32 %v3425_v51, %v1318_v54  ;;  %v1820_v53 = vrot.slane %v3373_v42, 4 }
 0x89a   :  { %1327 = vst.msk [vmem:[%s3723_s9] sm:$0xff] %vm68_vm1, %v1319_v55  ;;  %v1507_v56 = vpop.f32.mrf.mxu0 }
 0x89b   :  { %v1517_v57 = vadd.f32 %v1516_v23, %v1507_v56 }
 0x89c   :  { %v2759_v60 = vpop.f32.mrf.mxu0 }
 0x89d   :  { %v1518_v61 = vsub.f32 %v1517_v57, %v1511_v59 }
 0x89f   :  { %v1538_v3 = vrot.slane %v1518_v61, %v3018_v13  ;;  %vm1519_vm8 = vcmp.gt.f32.partialorder %v1518_v61, %v3027_v16  ;;  %v1615_v4 = vmul.f32 %v1518_v61, %v3020_v14 }
 0x8a0   :  { %v1520_v19 = vsel %vm1519_vm8, 1.0, %v2867_v0  ;;  %v1614_v35 = vsel %vm1519_vm8, %v3027_v16, 0.0 }
 0x8a1   :  { %v1539_v24 = vsel %vm346_vm7, %v1538_v3, %v1436_v12  ;;  %v1522_v25 = vadd.f32 %v1521_v15, %v1520_v19  ;;  %v1532_v26 = vrot.slane %v1520_v19, %v3018_v13  ;;  %2769 = vmatmul.mubr.msk.f32.vlgmr.msra.gmra.mxu1 %vm154_vm4, %v1520_v19  ;;  %v1618_v27 = vadd.f32 %v1616_v63, %v1615_v4 }
 0x8a2   :  { %2783 = vmatpush3.msra.mxu1 %v2945_v2  ;;  %2790 = vmatprep.mubr.msk.f32.mxu1 %vm2868_vm2, %v2867_v0 }
 0x8a3   :  { %v1526_v29 = vrot.slane %v1522_v25, %v3018_v13  ;;  %v1533_v30 = vsel %vm346_vm7, %v1532_v26, %v1424_v28  ;;  %2784 = vmatprep.subr.mxu1 %v2867_v0  ;;  %v1623_v39 = vmul.f32 0.6, %v1522_v25  ;;  %v1922_v25 = vrot.slane %v3373_v42, 5 }
 0x8a4   :  { %2785 = vmatpush3.msra.mxu1 %v2961_v5 }
 0x8a5   :  { %v1527_v31 = vsel %vm346_vm7, %v1526_v29, %v1424_v28  ;;  %2786 = vmatprep.subr.mxu1 %v2867_v0 }
 0x8a6   :  { %2787 = vmatpush3.msra.mxu1 %v2971_v6 }
 0x8a7   :  { %2788 = vmatprep.subr.mxu1 %v2867_v0 }
 0x8a8   :  { %2789 = vmatpush3.msra.mxu1 %v2979_v7 }
 0x8a9   :  { %2804 = vmatprep.subr.mxu1 %v2867_v0 }
 0x961   :  { %v1610_v33 = vpop.f32.mrf.mxu1 }
 0x962   :  { %v1619_v34 = vadd.f32 %v1618_v27, %v1610_v33 }
 0x963   :  { %v2770_v36 = vpop.f32.mrf.mxu1 }
 0x964   :  { %v1620_v20 = vsub.f32 %v1619_v34, %v1614_v35 }
 0x966   :  { %v1640_v38 = vrot.slane %v1620_v20, %v3018_v13  ;;  %vm1621_vm6 = vcmp.gt.f32.partialorder %v1620_v20, %v3027_v16  ;;  %v1717_v40 = vmul.f32 %v1620_v20, %v3020_v14 }
 0x967   :  { %v1622_v41 = vsel %vm1621_vm6, 1.0, %v2867_v0  ;;  %v1716_v22 = vsel %vm1621_vm6, %v3027_v16, 0.0 }
 0x968   :  { %v1641_v43 = vsel %vm454_vm9, %v1640_v38, %v1539_v24  ;;  %v1624_v44 = vadd.f32 %v1623_v39, %v1622_v41  ;;  %v1634_v45 = vrot.slane %v1622_v41, %v3018_v13  ;;  %2780 = vmatmul.mubr.msk.f32.vlgmr.msra.gmra.mxu0 %vm154_vm4, %v1622_v41  ;;  %v1720_v46 = vadd.f32 %v1718_v37, %v1717_v40 }
 0x969   :  { %2794 = vmatpush3.msra.mxu0 %v2945_v2  ;;  %2801 = vmatprep.mubr.msk.f32.mxu0 %vm2868_vm2, %v2867_v0  ;;  %v2024_v40 = vrot.slane %v3373_v42, 6 }
 0x96a   :  { %v1628_v47 = vrot.slane %v1624_v44, %v3018_v13  ;;  %v1635_v48 = vsel %vm454_vm9, %v1634_v45, %v1533_v30  ;;  %2795 = vmatprep.subr.mxu0 %v2867_v0  ;;  %v1725_v55 = vmul.f32 0.6, %v1624_v44 }
 0x96b   :  { %2796 = vmatpush3.msra.mxu0 %v2961_v5 }
 0x96c   :  { %v1629_v49 = vsel %vm454_vm9, %v1628_v47, %v1527_v31  ;;  %2797 = vmatprep.subr.mxu0 %v2867_v0 }
 0x96d   :  { %2798 = vmatpush3.msra.mxu0 %v2971_v6 }
 0x96e   :  { %2799 = vmatprep.subr.mxu0 %v2867_v0 }
 0x96f   :  { %2800 = vmatpush3.msra.mxu0 %v2979_v7 }
 0x970   :  { %2815 = vmatprep.subr.mxu0 %v2867_v0 }
 0xa28   :  { %v1712_v18 = vpop.f32.mrf.mxu0 }
 0xa29   :  { %v1721_v50 = vadd.f32 %v1720_v46, %v1712_v18 }
 0xa2a   :  { %v2781_v23 = vpop.f32.mrf.mxu0 }
 0xa2b   :  { %v1722_v52 = vsub.f32 %v1721_v50, %v1716_v22  ;;  %v2864_v50 = vld [vmem:[%s3712_s5 + $0x10] sm:$0xff]  ;;  %v2865_v23 = vld [vmem:[%s3712_s5 + $0x8] sm:$0xff] }
 0xa2d   :  { %v1742_v54 = vrot.slane %v1722_v52, %v3018_v13  ;;  %vm1723_vm7 = vcmp.gt.f32.partialorder %v1722_v52, %v3027_v16  ;;  %v1819_v56 = vmul.f32 %v1722_v52, %v3020_v14  ;;  %v2866_v52 = vld [vmem:[%s3712_s5] sm:$0xff] }
 0xa2e   :  { %v1724_v57 = vsel %vm1723_vm7, 1.0, %v2867_v0  ;;  %v1818_v12 = vsel %vm1723_vm7, %v3027_v16, 0.0 }
 0xa2f   :  { %v1743_v58 = vsel %vm562_vm11, %v1742_v54, %v1641_v43  ;;  %v1726_v59 = vadd.f32 %v1725_v55, %v1724_v57  ;;  %v1736_v60 = vrot.slane %v1724_v57, %v3018_v13  ;;  %2791 = vmatmul.mubr.msk.f32.vlgmr.msra.gmra.mxu1 %vm154_vm4, %v1724_v57  ;;  %v1822_v61 = vadd.f32 %v1820_v53, %v1819_v56 }
 0xa30   :  { %2805 = vmatpush3.msra.mxu1 %v2945_v2  ;;  %2812 = vmatprep.mubr.msk.f32.mxu1 %vm2868_vm2, %v2867_v0 }
 0xa31   :  { %v1730_v62 = vrot.slane %v1726_v59, %v3018_v13  ;;  %v1737_v63 = vsel %vm562_vm11, %v1736_v60, %v1635_v48  ;;  %2806 = vmatprep.subr.mxu1 %v2867_v0  ;;  %v1827_v27 = vmul.f32 0.6, %v1726_v59  ;;  %v2863_v48 = vld [vmem:[%s3712_s5 + $0x18] sm:$0xff] }
 0xa32   :  { %2807 = vmatpush3.msra.mxu1 %v2961_v5 }
 0xa33   :  { %2808 = vmatprep.subr.mxu1 %v2867_v0  ;;  %v1731_v15 = vsel %vm562_vm11, %v1730_v62, %v1629_v49 }
 0xa34   :  { %2809 = vmatpush3.msra.mxu1 %v2971_v6 }
 0xa35   :  { %2810 = vmatprep.subr.mxu1 %v2867_v0 }
 0xa36   :  { %2811 = vmatpush3.msra.mxu1 %v2979_v7 }
 0xa37   :  { %2826 = vmatprep.subr.mxu1 %v2867_v0 }
 0xaef   :  { %v1814_v3 = vpop.f32.mrf.mxu1 }
 0xaf0   :  { %v1823_v4 = vadd.f32 %v1822_v61, %v1814_v3 }
 0xaf1   :  { %v2792_v19 = vpop.f32.mrf.mxu1 }
 0xaf2   :  { %v1824_v24 = vsub.f32 %v1823_v4, %v1818_v12 }
 0xaf4   :  { %v1844_v26 = vrot.slane %v1824_v24, %v3018_v13  ;;  %vm1825_vm9 = vcmp.gt.f32.partialorder %v1824_v24, %v3027_v16  ;;  %v1921_v28 = vmul.f32 %v1824_v24, %v3020_v14 }
 0xaf5   :  { %v1826_v29 = vsel %vm1825_vm9, 1.0, %v2867_v0  ;;  %v1920_v38 = vsel %vm1825_vm9, %v3027_v16, 0.0 }
 0xaf6   :  { %v1845_v30 = vsel %vm670_vm13, %v1844_v26, %v1743_v58  ;;  %v1828_v31 = vadd.f32 %v1827_v27, %v1826_v29  ;;  %v1838_v33 = vrot.slane %v1826_v29, %v3018_v13  ;;  %2802 = vmatmul.mubr.msk.f32.vlgmr.msra.gmra.mxu0 %vm154_vm4, %v1826_v29  ;;  %v1924_v34 = vadd.f32 %v1922_v25, %v1921_v28 }
 0xaf7   :  { %2816 = vmatpush3.msra.mxu0 %v2945_v2  ;;  %2823 = vmatprep.mubr.msk.f32.mxu0 %vm2868_vm2, %v2867_v0  ;;  %v2126_v58 = vrot.slane %v3373_v42, 7 }
 0xaf8   :  { %v1832_v35 = vrot.slane %v1828_v31, %v3018_v13  ;;  %v1839_v36 = vsel %vm670_vm13, %v1838_v33, %v1737_v63  ;;  %2817 = vmatprep.subr.mxu0 %v2867_v0 }
 0xaf9   :  { %2818 = vmatpush3.msra.mxu0 %v2961_v5 }
 0xafa   :  { %2819 = vmatprep.subr.mxu0 %v2867_v0  ;;  %v1833_v20 = vsel %vm670_vm13, %v1832_v35, %v1731_v15 }
 0xafb   :  { %2820 = vmatpush3.msra.mxu0 %v2971_v6  ;;  %v1929_v6 = vmul.f32 0.6, %v1828_v31 }
 0xafc   :  { %2821 = vmatprep.subr.mxu0 %v2867_v0 }
 0xafd   :  { %2822 = vmatpush3.msra.mxu0 %v2979_v7 }
 0xafe   :  { %2837 = vmatprep.subr.mxu0 %v2867_v0 }
 0xbb6   :  { %v1916_v2 = vpop.f32.mrf.mxu0 }
 0xbb7   :  { %v1925_v37 = vadd.f32 %v1924_v34, %v1916_v2 }
 0xbb8   :  { %v2803_v5 = vpop.f32.mrf.mxu0 }
 0xbb9   :  { %v1926_v39 = vsub.f32 %v1925_v37, %v1920_v38 }
 0xbbb   :  { %v1946_v41 = vrot.slane %v1926_v39, %v3018_v13  ;;  %vm1927_vm11 = vcmp.gt.f32.partialorder %v1926_v39, %v3027_v16  ;;  %v2023_v43 = vmul.f32 %v1926_v39, %v3020_v14 }
 0xbbc   :  { %v1928_v7 = vsel %vm1927_vm11, 1.0, %v2867_v0  ;;  %v2022_v55 = vsel %vm1927_vm11, %v3027_v16, 0.0 }
 0xbbd   :  { %v1947_v44 = vsel %vm778_vm15, %v1946_v41, %v1845_v30  ;;  %v1930_v45 = vadd.f32 %v1929_v6, %v1928_v7  ;;  %v1940_v46 = vrot.slane %v1928_v7, %v3018_v13  ;;  %2813 = vmatmul.mubr.msk.f32.vlgmr.msra.gmra.mxu1 %vm154_vm4, %v1928_v7  ;;  %v2026_v47 = vadd.f32 %v2024_v40, %v2023_v43 }
 0xbbe   :  { %2827 = vmatpush3.msra.mxu1 %v2863_v48  ;;  %2834 = vmatprep.mubr.msk.f32.mxu1 %vm2868_vm2, %v2867_v0 }
 0xbbf   :  { %v1934_v49 = vrot.slane %v1930_v45, %v3018_v13  ;;  %v1941_v18 = vsel %vm778_vm15, %v1940_v46, %v1839_v36  ;;  %2828 = vmatprep.subr.mxu1 %v2867_v0  ;;  %v2031_v60 = vmul.f32 0.6, %v1930_v45 }
 0xbc0   :  { %2829 = vmatpush3.msra.mxu1 %v2864_v50 }
 0xbc1   :  { %2830 = vmatprep.subr.mxu1 %v2867_v0  ;;  %v1935_v22 = vsel %vm778_vm15, %v1934_v49, %v1833_v20 }
 0xbc2   :  { %2831 = vmatpush3.msra.mxu1 %v2865_v23 }
 0xbc3   :  { %2832 = vmatprep.subr.mxu1 %v2867_v0 }
 0xbc4   :  { %2833 = vmatpush3.msra.mxu1 %v2866_v52 }
 0xbc5   :  { %2848 = vmatprep.subr.mxu1 %v3318_v1 }
 0xc7d   :  { %v2018_v53 = vpop.f32.mrf.mxu1 }
 0xc7e   :  { %v2027_v54 = vadd.f32 %v2026_v47, %v2018_v53 }
 0xc7f   :  { %v2814_v56 = vpop.f32.mrf.mxu1 }
 0xc80   :  { %v2028_v57 = vsub.f32 %v2027_v54, %v2022_v55 }
 0xc82   :  { %v2048_v59 = vrot.slane %v2028_v57, %v3018_v13  ;;  %vm2029_vm13 = vcmp.gt.f32.partialorder %v2028_v57, %v3027_v16  ;;  %v2125_v61 = vmul.f32 %v2028_v57, %v3020_v14 }
 0xc83   :  { %v2030_v62 = vsel %vm2029_vm13, 1.0, %v2867_v0  ;;  %v2124_v26 = vsel %vm2029_vm13, %v3027_v16, 0.0 }
 0xc84   :  { %v2049_v63 = vsel %vm886_vm5, %v2048_v59, %v1947_v44  ;;  %v2032_v15 = vadd.f32 %v2031_v60, %v2030_v62  ;;  %v2042_v3 = vrot.slane %v2030_v62, %v3018_v13  ;;  %2824 = vmatmul.mubr.msk.f32.vlgmr.msra.gmra.mxu0 %vm154_vm4, %v2030_v62  ;;  %v2128_v42 = vadd.f32 %v2126_v58, %v2125_v61 }
 0xc85   :  { %2838 = vmatpush3.msra.mxu0 %v2863_v48  ;;  %2845 = vmatprep.mubr.msk.f32.mxu0 %vm2868_vm2, %v2867_v0 }
 0xc86   :  { %v2036_v4 = vrot.slane %v2032_v15, %v3018_v13  ;;  %v2043_v12 = vsel %vm886_vm5, %v2042_v3, %v1941_v18  ;;  %2839 = vmatprep.subr.mxu0 %v2867_v0  ;;  %v2133_v30 = vmul.f32 0.6, %v2032_v15 }
 0xc87   :  { %2840 = vmatpush3.msra.mxu0 %v2864_v50 }
 0xc88   :  { %v2037_v19 = vsel %vm886_vm5, %v2036_v4, %v1935_v22  ;;  %2841 = vmatprep.subr.mxu0 %v2867_v0 }
 0xc89   :  { %2842 = vmatpush3.msra.mxu0 %v2865_v23 }
 0xc8a   :  { %2843 = vmatprep.subr.mxu0 %v2867_v0 }
 0xc8b   :  { %2844 = vmatpush3.msra.mxu0 %v2866_v52 }
 0xd44   :  { %v2120_v24 = vpop.f32.mrf.mxu0 }
 0xd45   :  { %v2129_v25 = vadd.f32 %v2128_v42, %v2120_v24 }
 0xd46   :  { %v2825_v27 = vpop.f32.mrf.mxu0 }
 0xd47   :  { %v2130_v28 = vsub.f32 %v2129_v25, %v2124_v26 }
 0xd49   :  { %v2150_v29 = vrot.slane %v2130_v28, %v3018_v13  ;;  %vm2131_vm2 = vcmp.gt.f32.partialorder %v2130_v28, %v3027_v16 }
 0xd4a   :  { %v2132_v31 = vsel %vm2131_vm2, 1.0, %v2867_v0  ;;  %v2226_v5 = vsel %vm2131_vm2, %v3027_v16, 0.0 }
 0xd4b   :  { %v2151_v33 = vsel %vm994_vm10, %v2150_v29, %v2049_v63  ;;  %v2134_v34 = vadd.f32 %v2133_v30, %v2132_v31  ;;  %v2144_v35 = vrot.slane %v2132_v31, %v3018_v13  ;;  %2835 = vmatmul.mubr.msk.f32.vlgmr.msra.gmra.mxu1 %vm154_vm4, %v2132_v31 }
 0xd4c   :  { %2499 = vst.msk [vmem:[%s3718_s12 + $0x10] sm:$0xff] %vm154_vm4, %v2151_v33  ;;  %2849 = vmatpush3.msra.mxu1 %v3318_v1  ;;  %v2227_v1 = vmul.f32 %v2130_v28, %v3020_v14 }
 0xd4d   :  { %v2145_v36 = vsel %vm994_vm10, %v2144_v35, %v2043_v12  ;;  %v2138_v20 = vrot.slane %v2134_v34, %v3018_v13  ;;  %2850 = vmatprep.subr.mxu1 %v3325_v8 }
 0xd4e   :  { %2497 = vst.msk [vmem:[%s3719_s11 + $0x10] sm:$0xff] %vm154_vm4, %v2145_v36  ;;  %2851 = vmatpush3.msra.mxu1 %v3325_v8  ;;  %v2228_v8 = vadd.f32 %v2227_v1, %v1411_v9 }
 0xd4f   :  { %v2139_v2 = vsel %vm994_vm10, %v2138_v20, %v2037_v19  ;;  %2852 = vmatprep.subr.mxu1 %v3332_v10  ;;  %vm3725_vm10 = vcmask 25600  }
 0xd50   :  { %2495 = vst.msk [vmem:[%s3720_s10 + $0x10] sm:$0xff] %vm154_vm4, %v2139_v2  ;;  %2856 = vmatprep.mubr.msk.f32.mxu1 %vm154_vm4, %v2139_v2  ;;  %2853 = vmatpush3.msra.mxu1 %v3332_v10  ;;  %v2233_v10 = vmul.f32 0.6, %v2134_v34 }
 0xd51   :  { %2854 = vmatprep.subr.mxu1 %v3339_v11 }
 0xd52   :  { %2855 = vmatpush3.msra.mxu1 %v3339_v11 }
 0xe0b   :  { %v2222_v37 = vpop.f32.mrf.mxu1 }
 0xe0c   :  { %v2229_v38 = vadd.f32 %v2228_v8, %v2222_v37 }
 0xe0d   :  { %v2836_v39 = vpop.f32.mrf.mxu1 }
 0xe0e   :  { %v2230_v40 = vsub.f32 %v2229_v38, %v2226_v5 }
 0xe10   :  { %vm2231_vm15 = vcmp.gt.f32.partialorder %v2230_v40, %v3027_v16  ;;  %v2327_v6 = vmul.f32 %v2230_v40, %v3020_v14  ;;  %v2250_v44 = vrot.slane %v2230_v40, %v3018_v13 }
 0xe11   :  { %v2232_v41 = vsel %vm2231_vm15, 1.0, %v2867_v0  ;;  %v2326_v45 = vsel %vm2231_vm15, %v3027_v16, 0.0 }
 0xe12   :  { %v2234_v11 = vadd.f32 %v2233_v10, %v2232_v41  ;;  %2846 = vmatmul.mubr.msk.f32.vlgmr.msra.gmra.mxu0 %vm154_vm4, %v2232_v41  ;;  %v2331_v32 = vadd.f32 %v2329_v17, %v2327_v6  ;;  %v2244_v48 = vrot.slane %v2232_v41, %v3018_v13  ;;  %v2252_v14 = vsel %vm1101_vm0, %v2250_v44, 0.0 }
 0xe14   :  { %v2336_v49 = vmul.f32 0.6, %v2234_v11  ;;  %v2238_v22 = vrot.slane %v2234_v11, %v3018_v13  ;;  %v2246_v54 = vsel %vm1101_vm0, %v2244_v48, 0.0 }
 0xe16   :  { %v2240_v55 = vsel %vm1101_vm0, %v2238_v22, 0.0 }
 0xed2   :  { %v2322_v43 = vpop.f32.mrf.mxu0 }
 0xed3   :  { %v2332_v7 = vadd.f32 %v2331_v32, %v2322_v43 }
 0xed4   :  { %v2847_v46 = vpop.f32.mrf.mxu0 }
 0xed5   :  { %v2333_v47 = vsub.f32 %v2332_v7, %v2326_v45 }
 0xed7   :  { %vm2334_vm5 = vcmp.gt.f32.partialorder %v2333_v47, %v3027_v16  ;;  %v2353_v18 = vrot.slane %v2333_v47, %v3018_v13 }
 0xed8   :  { %v2335_v50 = vsel %vm2334_vm5, 1.0, %v2867_v0 }
 0xed9   :  { %v2337_v23 = vadd.f32 %v2336_v49, %v2335_v50  ;;  %v2347_v52 = vrot.slane %v2335_v50, %v3018_v13  ;;  %v2355_v53 = vsel %vm1210_vm3, %v2353_v18, %v2252_v14 }
 0xeda   :  { %2500 = vst.msk [vmem:[%s3718_s12 + $0x18] sm:$0x3] %vm1234_vm12, %v2355_v53 }
 0xedb   :  { %v2341_v16 = vrot.slane %v2337_v23, %v3018_v13  ;;  %v2349_v0 = vsel %vm1210_vm3, %v2347_v52, %v2246_v54 }
 0xedc   :  { %2498 = vst.msk [vmem:[%s3719_s11 + $0x18] sm:$0x3] %vm1234_vm12, %v2349_v0 }
 0xedd   :  { %v2343_v56 = vsel %vm1210_vm3, %v2341_v16, %v2240_v55 }
 0xede   :  { %2496 = vst.msk [vmem:[%s3720_s10 + $0x18] sm:$0x3] %vm1234_vm12, %v2343_v56  ;;  %2857 = vmatmul.mubr.msk.f32.vlgmr.msra.gmra.mxu1 %vm154_vm4, %v2343_v56 }
 0xf9e   :  { %v2858_v13 = vpop.f32.mrf.mxu1 }
 0xf9f   :  { %v2443_v57 = vadd.f32 %v2858_v13, %v3425_v51 }
 0xfa0   :  { %v2437_v58 = vpop.f32.mrf.mxu1 }
 0xfa1   :  { %2504 = vst.msk [vmem:[%s3723_s9 + $0x18] sm:$0x3] %vm3725_vm10, %v2443_v57  ;;  %v2438_v59 = vadd.f32 %v3425_v51, %v2437_v58 }
 0xfa3   :  { %2503 = vst.msk [vmem:[%s3723_s9 + $0x10] sm:$0xff] %vm68_vm1, %v2438_v59 }

</bundles_post_ra>
